<compile_context>
chip_gen: v5e
topology: v5e:2x2
jax: 0.10.0
libtpu: 0.0.40
codegen_flags: <defaults>
</compile_context>

<pallas_src>
import functools
import math
import re

import jax
import jax.numpy as jnp
from jax import lax
from jax.experimental import pallas as pl
from jax.experimental.pallas import tpu as pltpu

LN_EPS = 1e-5  # nn.LayerNorm default


# ---------------------------------------------------------------------------
# Per-generation configuration (VMEM budget, tile sizes, bf16 elementwise)
# ---------------------------------------------------------------------------
@functools.lru_cache(maxsize=1)
def _tpu_config():
    gen = 0
    try:
        kind = jax.devices()[0].device_kind
        m = re.search(r"(\d+)", kind)
        gen = int(m.group(1)) if m else 0
    except Exception:
        pass
    try:
        vmem_phys = int(pltpu.get_tpu_info().vmem_capacity_bytes)
    except Exception:
        vmem_phys = (64 if gen >= 7 else 128) * (1 << 20)
    vmem_budget = max(32 << 20, int(vmem_phys * 0.82))

    if gen >= 7:
        # v7x: 64 MiB VMEM / TC, 2 TensorCores, bf16 VPU/EUP available.
        return dict(vmem_limit=min(vmem_budget, 56 << 20), rows_per_step=256,
                    fc_tm=1024, bf16_eltwise=True, num_cores=2)
    if gen == 6:
        # v6e: 128 MiB VMEM, 1 TC, bf16 VPU/EUP available.
        return dict(vmem_limit=min(vmem_budget, 110 << 20), rows_per_step=768,
                    fc_tm=2048, bf16_eltwise=True, num_cores=1)
    if gen == 5:
        # v5e: 128 MiB VMEM, 1 TC, no bf16 VPU/EUP -> keep f32 elementwise.
        return dict(vmem_limit=min(vmem_budget, 110 << 20), rows_per_step=768,
                    fc_tm=2048, bf16_eltwise=False, num_cores=1)
    # Unknown generation: conservative.
    return dict(vmem_limit=min(vmem_budget, 48 << 20), rows_per_step=256,
                fc_tm=1024, bf16_eltwise=False, num_cores=1)


# ---------------------------------------------------------------------------
# In-kernel helpers (pure jnp, traced inside the Pallas kernel body)
# ---------------------------------------------------------------------------
def _layernorm(x, gamma, beta):
    # Matches nn.LayerNorm: biased variance over the last dim, eps=1e-5.
    mean = jnp.mean(x, axis=-1, keepdims=True)
    var = jnp.mean(jnp.square(x - mean), axis=-1, keepdims=True)
    return (x - mean) * lax.rsqrt(var + LN_EPS) * gamma + beta


def _erf_poly(x):
    # Abramowitz & Stegun 7.1.26 rational approximation of erf (max err ~1.5e-7 in f32).
    p = 0.3275911
    a1, a2, a3, a4, a5 = (0.254829592, -0.284496736, 1.421413741,
                          -1.453152027, 1.061405429)
    ax = jnp.abs(x)
    t = 1.0 / (1.0 + p * ax)
    poly = ((((a5 * t + a4) * t + a3) * t + a2) * t + a1) * t
    y = 1.0 - poly * jnp.exp(-ax * ax)
    return jnp.where(x >= 0.0, y, -y)


def _gelu_exact(x):
    # nn.GELU() default: 0.5*x*(1+erf(x/sqrt(2)))
    return 0.5 * x * (1.0 + _erf_poly(x * (1.0 / math.sqrt(2.0))))


def _largest_divisor_leq(n, target):
    # Largest divisor of n that is <= target (keeps batch blocks evenly dividing).
    for d in range(min(n, target), 0, -1):
        if n % d == 0:
            return d
    return 1


# ---------------------------------------------------------------------------
# Fused TransformerBlock kernel (one grid step == one batch tile)
# ---------------------------------------------------------------------------
def transformer_block_kernel(num_heads, bf16_eltwise,
                             x_ref,
                             wqkv_ref, bqkv_ref,
                             wo_ref, bo_ref,
                             ln1w_ref, ln1b_ref, ln2w_ref, ln2b_ref,
                             w1_ref, b1_ref, w2_ref, b2_ref,
                             o_ref):
    Bt, S, E = x_ref.shape
    hd = E // num_heads
    scale = 1.0 / math.sqrt(hd)
    R = Bt * S
    ew = jnp.bfloat16 if bf16_eltwise else jnp.float32   # elementwise dtype

    xb = x_ref[...].reshape(R, E)                  # (R, E) bf16 activations
    x = xb.astype(jnp.float32)                     # f32 copy for residuals / LN

    # Fused QKV projection: one wide MXU pass (bf16 in, f32 accumulate).
    qkv = jnp.dot(xb, wqkv_ref[...],
                  preferred_element_type=jnp.float32) + bqkv_ref[...]   # (R, 3E) f32
    q = (qkv[:, :E] * scale).astype(jnp.bfloat16)  # fold 1/sqrt(hd) into q
    k = qkv[:, E:2 * E].astype(jnp.bfloat16)
    v = qkv[:, 2 * E:].astype(jnp.bfloat16)

    wo = wo_ref[...]                               # (E, E) bf16

    # Attention: static unroll over heads (num_heads is small at this size);
    # each head is batched over the batch dim with 3-D contractions and its
    # output is folded straight into the output projection (sum of per-head
    # row blocks of Wo), avoiding a lane-dim concatenate.
    # TODO(synk): at S >= ~512 use flash-style KV streaming + fori_loop over
    # heads (bounds S*S live ranges); at GPT-2 scale also 128-align per-head
    # slices / batch heads to use more of the MXU's K dim.
    attn = jnp.zeros((R, E), jnp.float32)
    for h in range(num_heads):
        sl = slice(h * hd, (h + 1) * hd)
        qh = q[:, sl].reshape(Bt, S, hd)
        kh = k[:, sl].reshape(Bt, S, hd)
        vh = v[:, sl].reshape(Bt, S, hd)
        s = jnp.einsum("bqd,bkd->bqk", qh, kh,
                       preferred_element_type=jnp.float32)              # (Bt,S,S) f32
        s = s - jnp.max(s, axis=-1, keepdims=True)
        e = jnp.exp(s.astype(ew))                                       # bf16 EUP on v6e/v7x
        denom = jnp.sum(e.astype(jnp.float32), axis=-1, keepdims=True)  # f32 row sums
        p = (e * pl.reciprocal(denom, approx=True).astype(ew)).astype(jnp.bfloat16)
        oh = jnp.einsum("bqk,bkd->bqd", p, vh,
                        preferred_element_type=jnp.float32)             # (Bt,S,hd) f32
        attn = attn + jnp.dot(oh.reshape(R, hd).astype(jnp.bfloat16),
                              wo[sl, :], preferred_element_type=jnp.float32)
    attn = attn + bo_ref[...]

    # Residual + LayerNorm 1 (f32)
    x1 = _layernorm(x + attn, ln1w_ref[...], ln1b_ref[...])             # (R, E) f32

    # Feed-forward: Linear -> GELU(exact) -> Linear  (bf16 matmuls, f32 accum)
    h1 = jnp.dot(x1.astype(jnp.bfloat16), w1_ref[...],
                 preferred_element_type=jnp.float32) + b1_ref[...]
    h1 = _gelu_exact(h1.astype(ew)).astype(jnp.bfloat16)                # bf16 VPU on v6e/v7x
    h2 = jnp.dot(h1, w2_ref[...],
                 preferred_element_type=jnp.float32) + b2_ref[...]

    # Residual + LayerNorm 2, store bf16 (bf16 activations at kernel boundaries)
    out = _layernorm(x1 + h2, ln2w_ref[...], ln2b_ref[...])
    o_ref[...] = out.reshape(Bt, S, E).astype(o_ref.dtype)


def transformer_block(x, p, num_heads, cfg):
    """x: (N, S, E) bfloat16 -> (N, S, E) bfloat16."""
    N, S, E = x.shape
    Hf = p["w1"].shape[1]

    # Batch-tile the grid so each step processes ~rows_per_step rows; on
    # multi-TensorCore parts make sure there are >= 2 "parallel" grid steps.
    target_bn = max(1, cfg["rows_per_step"] // S)
    if cfg["num_cores"] >= 2 and N >= 2:
        target_bn = min(target_bn, N // 2)
    block_n = _largest_divisor_leq(N, max(1, target_bn))
    grid = (N // block_n,)

    def inv(shape):
        # grid-invariant operand (weights / biases / LN params)
        return pl.BlockSpec(shape, lambda n: (0,) * len(shape))

    in_specs = [
        pl.BlockSpec((block_n, S, E), lambda n: (n, 0, 0)),   # x (bf16)
        inv((E, 3 * E)), inv((1, 3 * E)),                     # wqkv, bqkv
        inv((E, E)), inv((1, E)),                             # wo, bo
        inv((1, E)), inv((1, E)), inv((1, E)), inv((1, E)),   # ln1w ln1b ln2w ln2b
        inv((E, Hf)), inv((1, Hf)),                           # w1, b1
        inv((Hf, E)), inv((1, E)),                            # w2, b2
    ]

    flops = 2 * N * S * E * (3 * E + 2 * S + E + 2 * Hf)
    transcendentals = N * num_heads * S * S + N * S * Hf
    bytes_accessed = (2 * 2 * N * S * E                        # x in + out (bf16)
                      + 2 * (3 * E * E + E * E + 2 * E * Hf)   # bf16 weights
                      + 4 * (3 * E + 6 * E + Hf))              # f32 biases / LN params

    return pl.pallas_call(
        functools.partial(transformer_block_kernel, num_heads, cfg["bf16_eltwise"]),
        out_shape=jax.ShapeDtypeStruct((N, S, E), jnp.bfloat16),
        grid=grid,
        in_specs=in_specs,
        out_specs=pl.BlockSpec((block_n, S, E), lambda n: (n, 0, 0)),
        compiler_params=pltpu.CompilerParams(
            dimension_semantics=("parallel",),
            vmem_limit_bytes=cfg["vmem_limit"]),
        cost_estimate=pl.CostEstimate(flops=flops,
                                      transcendentals=transcendentals,
                                      bytes_accessed=bytes_accessed),
    )(x,
      p["wqkv"], p["bqkv"], p["wo"], p["bo"],
      p["ln1w"], p["ln1b"], p["ln2w"], p["ln2b"],
      p["w1"], p["b1"], p["w2"], p["b2"])


# ---------------------------------------------------------------------------
# fc_out (vocab projection) kernel — lane-dense cdiv-tiled (row tiles x vocab tiles)
# ---------------------------------------------------------------------------
def fc_out_kernel(x_ref, w_ref, b_ref, o_ref):
    o_ref[...] = (jnp.dot(x_ref[...], w_ref[...],
                          preferred_element_type=jnp.float32) + b_ref[...])


def fc_out(x2d, w, b2d, cfg):
    """x2d: (M, E) bfloat16, w: (E, V) bfloat16 -> (M, V) float32 logits."""
    M, E = x2d.shape
    V = w.shape[1]
    # Fixed lane-dense tiles; pl.cdiv grid lets Pallas clip the ragged last
    # block (OOB rows/cols only produce discarded outputs; K=E is never padded).
    tm = M if M <= cfg["fc_tm"] else cfg["fc_tm"]   # fc_tm is a multiple of 8
    tv = V if V <= 512 else 512                     # 512 = multiple of 128 lanes
    grid = (pl.cdiv(M, tm), pl.cdiv(V, tv))

    flops = 2 * M * E * V
    bytes_accessed = 2 * M * E + 2 * E * V * grid[0] + 4 * M * V + 4 * V

    return pl.pallas_call(
        fc_out_kernel,
        out_shape=jax.ShapeDtypeStruct((M, V), jnp.float32),
        grid=grid,
        in_specs=[pl.BlockSpec((tm, E), lambda i, j: (i, 0)),   # x (bf16)
                  pl.BlockSpec((E, tv), lambda i, j: (0, j)),   # weight tile (bf16)
                  pl.BlockSpec((1, tv), lambda i, j: (0, j))],  # bias tile (f32)
        out_specs=pl.BlockSpec((tm, tv), lambda i, j: (i, j)),
        compiler_params=pltpu.CompilerParams(
            dimension_semantics=("parallel", "parallel"),
            vmem_limit_bytes=cfg["vmem_limit"]),
        cost_estimate=pl.CostEstimate(flops=flops, transcendentals=0,
                                      bytes_accessed=bytes_accessed),
    )(x2d, w, b2d)


# ---------------------------------------------------------------------------
# Full model forward (glue + Pallas kernels)
# ---------------------------------------------------------------------------
def mygpt2_forward(tokens, params, num_heads):
    cfg = _tpu_config()
    N, S = tokens.shape
    h = params["tok_emb"][tokens] + params["pos_emb"][jnp.arange(S)][None, :, :]
    h = h.astype(jnp.bfloat16)          # bf16 activations at kernel boundaries
    # dropout: inference no-op
    for lp in params["layers"]:
        h = transformer_block(h, lp, num_heads, cfg)
    E = h.shape[-1]
    logits = fc_out(h.reshape(N * S, E), params["fc_w"], params["fc_b"], cfg)
    return logits.reshape(N, S, -1)


# ---------------------------------------------------------------------------
# Pure-JAX reference (f32 math; same bf16-stored weights upcast; bf16 at the
# same kernel-boundary points so the comparison isolates in-kernel precision)
# ---------------------------------------------------------------------------
def _ref_block(x, p, num_heads):
    f32 = jnp.float32
    E = x.shape[-1]
    hd = E // num_heads
    qkv = x @ p["wqkv"].astype(f32) + p["bqkv"][0]
    q, k, v = qkv[..., :E], qkv[..., E:2 * E], qkv[..., 2 * E:]
    outs = []
    for h in range(num_heads):
        sl = slice(h * hd, (h + 1) * hd)
        s = jnp.einsum("nqd,nkd->nqk", q[..., sl], k[..., sl]) / math.sqrt(hd)
        outs.append(jnp.einsum("nqk,nkd->nqd", jax.nn.softmax(s, axis=-1), v[..., sl]))
    attn = jnp.concatenate(outs, -1) @ p["wo"].astype(f32) + p["bo"][0]
    x1 = _layernorm(x + attn, p["ln1w"][0], p["ln1b"][0])
    h1 = jax.nn.gelu(x1 @ p["w1"].astype(f32) + p["b1"][0], approximate=False)
    h2 = h1 @ p["w2"].astype(f32) + p["b2"][0]
    return _layernorm(x1 + h2, p["ln2w"][0], p["ln2b"][0])


def ref_forward(tokens, params, num_heads):
    N, S = tokens.shape
    h = params["tok_emb"][tokens] + params["pos_emb"][jnp.arange(S)][None, :, :]
    h = h.astype(jnp.bfloat16)
    for lp in params["layers"]:
        h = _ref_block(h.astype(jnp.float32), lp, num_heads).astype(jnp.bfloat16)
    return h.astype(jnp.float32) @ params["fc_w"].astype(jnp.float32) + params["fc_b"][0]


# ---------------------------------------------------------------------------
# Deterministic parameter initialization (synthetic, not a checkpoint load)
# ---------------------------------------------------------------------------
def init_params(key, vocab_size, E, num_layers, forward_expansion, max_length):
    H = forward_expansion * E
    ks = jax.random.split(key, 3 + num_layers)

    def rnd(k, shape, scale=0.02):
        return scale * jax.random.normal(k, shape, jnp.float32)

    params = {
        "tok_emb": rnd(ks[0], (vocab_size, E)),
        "pos_emb": rnd(ks[1], (max_length, E)),
        # matmul weights stored bf16 (MXU native); biases / LN params f32
        "fc_w": rnd(ks[2], (E, vocab_size)).astype(jnp.bfloat16),
        "fc_b": jnp.zeros((1, vocab_size), jnp.float32),
        "layers": [],
    }
    for i in range(num_layers):
        lk = jax.random.split(ks[3 + i], 10)
        layer = {
            # weights pre-transposed (in_dim, out_dim) so kernels do x @ W;
            # QKV fused as [wq | wk | wv] along the output dim.
            "wqkv": rnd(lk[0], (E, 3 * E)).astype(jnp.bfloat16),
            "bqkv": rnd(lk[1], (1, 3 * E)),
            "wo": rnd(lk[2], (E, E)).astype(jnp.bfloat16),
            "bo": rnd(lk[3], (1, E)),
            "ln1w": 1.0 + rnd(lk[4], (1, E)), "ln1b": rnd(lk[5], (1, E)),
            "ln2w": 1.0 + rnd(lk[6], (1, E)), "ln2b": rnd(lk[7], (1, E)),
            "w1": rnd(lk[8], (E, H)).astype(jnp.bfloat16),
            "b1": jnp.zeros((1, H), jnp.float32),
            "w2": rnd(lk[9], (H, E)).astype(jnp.bfloat16),
            "b2": jnp.zeros((1, E), jnp.float32),
        }
        params["layers"].append(layer)
    return params


# ---------------------------------------------------------------------------
if __name__ == "__main__":
    # Small hyper-parameters consistent with MyGPT2.__init__
    vocab_size, embedding_size = 64, 32
    num_layers, num_heads, forward_expansion = 2, 4, 4
    dropout, max_length = 0.0, 16
    N, S = 2, 8

    key = jax.random.PRNGKey(0)
    pkey, tkey = jax.random.split(key)
    params = init_params(pkey, vocab_size, embedding_size, num_layers,
                         forward_expansion, max_length)
    tokens = jax.random.randint(tkey, (N, S), 0, vocab_size, dtype=jnp.int32)

    logits = mygpt2_forward(tokens, params, num_heads)
    logits = jax.block_until_ready(logits)

    ref = ref_forward(tokens, params, num_heads)
    assert logits.shape == (N, S, vocab_size), logits.shape
    # Tolerance accounts for bf16 MXU inputs / bf16 layer-boundary activations,
    # approx reciprocal in softmax, erf polynomial, and (v6e/v7x) bf16
    # elementwise GELU/exp; reference uses the same bf16 weights + boundaries
    # but f32 internal activations.
    if not jnp.allclose(logits, ref, atol=2.5e-2, rtol=2.5e-2):
        raise AssertionError(
            f"mismatch vs reference, max abs err={float(jnp.max(jnp.abs(logits - ref)))}")

    print("KERNEL_OK")
</pallas_src>

<mosaic_0001>
module attributes {stable_mosaic.version = 11 : i64} {
  func.func @transformer_block_kernel(%arg0: i32, %arg1: memref<2x8x32xbf16, #tpu.memory_space<vmem>>, %arg2: memref<32x96xbf16, #tpu.memory_space<vmem>>, %arg3: memref<1x96xf32, #tpu.memory_space<vmem>>, %arg4: memref<32x32xbf16, #tpu.memory_space<vmem>>, %arg5: memref<1x32xf32, #tpu.memory_space<vmem>>, %arg6: memref<1x32xf32, #tpu.memory_space<vmem>>, %arg7: memref<1x32xf32, #tpu.memory_space<vmem>>, %arg8: memref<1x32xf32, #tpu.memory_space<vmem>>, %arg9: memref<1x32xf32, #tpu.memory_space<vmem>>, %arg10: memref<32x128xbf16, #tpu.memory_space<vmem>>, %arg11: memref<1x128xf32, #tpu.memory_space<vmem>>, %arg12: memref<128x32xbf16, #tpu.memory_space<vmem>>, %arg13: memref<1x32xf32, #tpu.memory_space<vmem>>, %arg14: memref<2x8x32xbf16, #tpu.memory_space<vmem>>) attributes {dimension_semantics = [#tpu.dimension_semantics<parallel>], iteration_bounds = array<i64: 1>, scalar_prefetch = 0 : i64, scratch_operands = 0 : i64, tpu.core_type = #tpu.core_type<tc>, window_params = [{transform_indices = @transform_0, window_bounds = array<i64: 2, 8, 32>}, {pipeline_mode = #tpu.pipeline_mode<synchronous>, transform_indices = @transform_1, window_bounds = array<i64: 32, 96>}, {pipeline_mode = #tpu.pipeline_mode<synchronous>, transform_indices = @transform_2, window_bounds = array<i64: 1, 96>}, {pipeline_mode = #tpu.pipeline_mode<synchronous>, transform_indices = @transform_3, window_bounds = array<i64: 32, 32>}, {pipeline_mode = #tpu.pipeline_mode<synchronous>, transform_indices = @transform_4, window_bounds = array<i64: 1, 32>}, {pipeline_mode = #tpu.pipeline_mode<synchronous>, transform_indices = @transform_5, window_bounds = array<i64: 1, 32>}, {pipeline_mode = #tpu.pipeline_mode<synchronous>, transform_indices = @transform_6, window_bounds = array<i64: 1, 32>}, {pipeline_mode = #tpu.pipeline_mode<synchronous>, transform_indices = @transform_7, window_bounds = array<i64: 1, 32>}, {pipeline_mode = #tpu.pipeline_mode<synchronous>, transform_indices = @transform_8, window_bounds = array<i64: 1, 32>}, {pipeline_mode = #tpu.pipeline_mode<synchronous>, transform_indices = @transform_9, window_bounds = array<i64: 32, 128>}, {pipeline_mode = #tpu.pipeline_mode<synchronous>, transform_indices = @transform_10, window_bounds = array<i64: 1, 128>}, {pipeline_mode = #tpu.pipeline_mode<synchronous>, transform_indices = @transform_11, window_bounds = array<i64: 128, 32>}, {pipeline_mode = #tpu.pipeline_mode<synchronous>, transform_indices = @transform_12, window_bounds = array<i64: 1, 32>}, {transform_indices = @transform_13, window_bounds = array<i64: 2, 8, 32>}]} {
    %c0 = arith.constant 0 : index
    %c0_0 = arith.constant 0 : index
    %c0_1 = arith.constant 0 : index
    %0 = vector.load %arg1[%c0, %c0_0, %c0_1] : memref<2x8x32xbf16, #tpu.memory_space<vmem>>, vector<2x8x32xbf16>
    %1 = vector.shape_cast %0 : vector<2x8x32xbf16> to vector<16x32xbf16>
    %2 = arith.extf %1 : vector<16x32xbf16> to vector<16x32xf32>
    %c0_2 = arith.constant 0 : index
    %c0_3 = arith.constant 0 : index
    %3 = vector.load %arg2[%c0_2, %c0_3] : memref<32x96xbf16, #tpu.memory_space<vmem>>, vector<32x96xbf16>
    %cst = arith.constant dense<0.000000e+00> : vector<16x96xf32>
    %4 = tpu.matmul %1, %3, %cst {dimension_numbers = #tpu.dot_dimension_numbers<[1], [0], [0], [1], [0, 0, 1, 1], [], []>} : vector<16x32xbf16>, vector<32x96xbf16>, vector<16x96xf32> -> vector<16x96xf32>
    %c0_4 = arith.constant 0 : index
    %c0_5 = arith.constant 0 : index
    %5 = vector.load %arg3[%c0_4, %c0_5] : memref<1x96xf32, #tpu.memory_space<vmem>>, vector<1x96xf32>
    %6 = vector.broadcast %5 : vector<1x96xf32> to vector<16x96xf32>
    %7 = arith.addf %4, %6 : vector<16x96xf32>
    %8 = vector.extract_strided_slice %7 {offsets = [0, 0], sizes = [16, 32], strides = [1, 1]} : vector<16x96xf32> to vector<16x32xf32>
    %cst_6 = arith.constant 0.353553385 : f32
    %9 = vector.broadcast %cst_6 : f32 to vector<16x32xf32>
    %10 = arith.mulf %8, %9 : vector<16x32xf32>
    %11 = arith.truncf %10 : vector<16x32xf32> to vector<16x32xbf16>
    %12 = vector.extract_strided_slice %7 {offsets = [0, 32], sizes = [16, 32], strides = [1, 1]} : vector<16x96xf32> to vector<16x32xf32>
    %13 = arith.truncf %12 : vector<16x32xf32> to vector<16x32xbf16>
    %14 = vector.extract_strided_slice %7 {offsets = [0, 64], sizes = [16, 32], strides = [1, 1]} : vector<16x96xf32> to vector<16x32xf32>
    %15 = arith.truncf %14 : vector<16x32xf32> to vector<16x32xbf16>
    %c0_7 = arith.constant 0 : index
    %c0_8 = arith.constant 0 : index
    %16 = vector.load %arg4[%c0_7, %c0_8] : memref<32x32xbf16, #tpu.memory_space<vmem>>, vector<32x32xbf16>
    %cst_9 = arith.constant 0.000000e+00 : f32
    %17 = vector.broadcast %cst_9 : f32 to vector<16x32xf32>
    %18 = vector.extract_strided_slice %11 {offsets = [0, 0], sizes = [16, 8], strides = [1, 1]} : vector<16x32xbf16> to vector<16x8xbf16>
    %19 = vector.shape_cast %18 : vector<16x8xbf16> to vector<2x8x8xbf16>
    %20 = vector.extract_strided_slice %13 {offsets = [0, 0], sizes = [16, 8], strides = [1, 1]} : vector<16x32xbf16> to vector<16x8xbf16>
    %21 = vector.shape_cast %20 : vector<16x8xbf16> to vector<2x8x8xbf16>
    %22 = vector.extract_strided_slice %15 {offsets = [0, 0], sizes = [16, 8], strides = [1, 1]} : vector<16x32xbf16> to vector<16x8xbf16>
    %23 = vector.shape_cast %22 : vector<16x8xbf16> to vector<2x8x8xbf16>
    "tpu.trace_start"() <{level = 10 : i32, message = "bqd,bkd->bqk"}> : () -> ()
    %cst_10 = arith.constant dense<0.000000e+00> : vector<2x8x8xf32>
    %24 = tpu.matmul %19, %21, %cst_10 {dimension_numbers = #tpu.dot_dimension_numbers<[2], [2], [1], [1], [0, 0, 0, 1, 1, 1], [0], [0]>} : vector<2x8x8xbf16>, vector<2x8x8xbf16>, vector<2x8x8xf32> -> vector<2x8x8xf32>
    "tpu.trace_stop"() : () -> ()
    %cst_11 = arith.constant dense<0xFF800000> : vector<2x8xf32>
    %25 = vector.multi_reduction <maximumf>, %24, %cst_11 [2] : vector<2x8x8xf32> to vector<2x8xf32>
    %26 = vector.shape_cast %25 : vector<2x8xf32> to vector<2x8x1xf32>
    %27 = vector.broadcast %26 : vector<2x8x1xf32> to vector<2x8x8xf32>
    %28 = arith.subf %24, %27 : vector<2x8x8xf32>
    %29 = math.exp %28 : vector<2x8x8xf32>
    %cst_12 = arith.constant dense<0.000000e+00> : vector<2x8xf32>
    %30 = vector.multi_reduction <add>, %29, %cst_12 [2] : vector<2x8x8xf32> to vector<2x8xf32>
    %31 = vector.shape_cast %30 : vector<2x8xf32> to vector<2x8x1xf32>
    %32 = tpu.reciprocal %31 {approx = true} : vector<2x8x1xf32> -> vector<2x8x1xf32>
    %33 = vector.broadcast %32 : vector<2x8x1xf32> to vector<2x8x8xf32>
    %34 = arith.mulf %29, %33 : vector<2x8x8xf32>
    %35 = arith.truncf %34 : vector<2x8x8xf32> to vector<2x8x8xbf16>
    "tpu.trace_start"() <{level = 10 : i32, message = "bqk,bkd->bqd"}> : () -> ()
    %cst_13 = arith.constant dense<0.000000e+00> : vector<2x8x8xf32>
    %36 = tpu.matmul %35, %23, %cst_13 {dimension_numbers = #tpu.dot_dimension_numbers<[2], [1], [1], [2], [0, 0, 0, 1, 1, 2], [0], [0]>} : vector<2x8x8xbf16>, vector<2x8x8xbf16>, vector<2x8x8xf32> -> vector<2x8x8xf32>
    "tpu.trace_stop"() : () -> ()
    %37 = vector.shape_cast %36 : vector<2x8x8xf32> to vector<16x8xf32>
    %38 = arith.truncf %37 : vector<16x8xf32> to vector<16x8xbf16>
    %39 = vector.extract_strided_slice %16 {offsets = [0, 0], sizes = [8, 32], strides = [1, 1]} : vector<32x32xbf16> to vector<8x32xbf16>
    %cst_14 = arith.constant dense<0.000000e+00> : vector<16x32xf32>
    %40 = tpu.matmul %38, %39, %cst_14 {dimension_numbers = #tpu.dot_dimension_numbers<[1], [0], [0], [1], [0, 0, 1, 1], [], []>} : vector<16x8xbf16>, vector<8x32xbf16>, vector<16x32xf32> -> vector<16x32xf32>
    %41 = arith.addf %17, %40 : vector<16x32xf32>
    %42 = vector.extract_strided_slice %11 {offsets = [0, 8], sizes = [16, 8], strides = [1, 1]} : vector<16x32xbf16> to vector<16x8xbf16>
    %43 = vector.shape_cast %42 : vector<16x8xbf16> to vector<2x8x8xbf16>
    %44 = vector.extract_strided_slice %13 {offsets = [0, 8], sizes = [16, 8], strides = [1, 1]} : vector<16x32xbf16> to vector<16x8xbf16>
    %45 = vector.shape_cast %44 : vector<16x8xbf16> to vector<2x8x8xbf16>
    %46 = vector.extract_strided_slice %15 {offsets = [0, 8], sizes = [16, 8], strides = [1, 1]} : vector<16x32xbf16> to vector<16x8xbf16>
    %47 = vector.shape_cast %46 : vector<16x8xbf16> to vector<2x8x8xbf16>
    "tpu.trace_start"() <{level = 10 : i32, message = "bqd,bkd->bqk"}> : () -> ()
    %cst_15 = arith.constant dense<0.000000e+00> : vector<2x8x8xf32>
    %48 = tpu.matmul %43, %45, %cst_15 {dimension_numbers = #tpu.dot_dimension_numbers<[2], [2], [1], [1], [0, 0, 0, 1, 1, 1], [0], [0]>} : vector<2x8x8xbf16>, vector<2x8x8xbf16>, vector<2x8x8xf32> -> vector<2x8x8xf32>
    "tpu.trace_stop"() : () -> ()
    %cst_16 = arith.constant dense<0xFF800000> : vector<2x8xf32>
    %49 = vector.multi_reduction <maximumf>, %48, %cst_16 [2] : vector<2x8x8xf32> to vector<2x8xf32>
    %50 = vector.shape_cast %49 : vector<2x8xf32> to vector<2x8x1xf32>
    %51 = vector.broadcast %50 : vector<2x8x1xf32> to vector<2x8x8xf32>
    %52 = arith.subf %48, %51 : vector<2x8x8xf32>
    %53 = math.exp %52 : vector<2x8x8xf32>
    %cst_17 = arith.constant dense<0.000000e+00> : vector<2x8xf32>
    %54 = vector.multi_reduction <add>, %53, %cst_17 [2] : vector<2x8x8xf32> to vector<2x8xf32>
    %55 = vector.shape_cast %54 : vector<2x8xf32> to vector<2x8x1xf32>
    %56 = tpu.reciprocal %55 {approx = true} : vector<2x8x1xf32> -> vector<2x8x1xf32>
    %57 = vector.broadcast %56 : vector<2x8x1xf32> to vector<2x8x8xf32>
    %58 = arith.mulf %53, %57 : vector<2x8x8xf32>
    %59 = arith.truncf %58 : vector<2x8x8xf32> to vector<2x8x8xbf16>
    "tpu.trace_start"() <{level = 10 : i32, message = "bqk,bkd->bqd"}> : () -> ()
    %cst_18 = arith.constant dense<0.000000e+00> : vector<2x8x8xf32>
    %60 = tpu.matmul %59, %47, %cst_18 {dimension_numbers = #tpu.dot_dimension_numbers<[2], [1], [1], [2], [0, 0, 0, 1, 1, 2], [0], [0]>} : vector<2x8x8xbf16>, vector<2x8x8xbf16>, vector<2x8x8xf32> -> vector<2x8x8xf32>
    "tpu.trace_stop"() : () -> ()
    %61 = vector.shape_cast %60 : vector<2x8x8xf32> to vector<16x8xf32>
    %62 = arith.truncf %61 : vector<16x8xf32> to vector<16x8xbf16>
    %63 = vector.extract_strided_slice %16 {offsets = [8, 0], sizes = [8, 32], strides = [1, 1]} : vector<32x32xbf16> to vector<8x32xbf16>
    %cst_19 = arith.constant dense<0.000000e+00> : vector<16x32xf32>
    %64 = tpu.matmul %62, %63, %cst_19 {dimension_numbers = #tpu.dot_dimension_numbers<[1], [0], [0], [1], [0, 0, 1, 1], [], []>} : vector<16x8xbf16>, vector<8x32xbf16>, vector<16x32xf32> -> vector<16x32xf32>
    %65 = arith.addf %41, %64 : vector<16x32xf32>
    %66 = vector.extract_strided_slice %11 {offsets = [0, 16], sizes = [16, 8], strides = [1, 1]} : vector<16x32xbf16> to vector<16x8xbf16>
    %67 = vector.shape_cast %66 : vector<16x8xbf16> to vector<2x8x8xbf16>
    %68 = vector.extract_strided_slice %13 {offsets = [0, 16], sizes = [16, 8], strides = [1, 1]} : vector<16x32xbf16> to vector<16x8xbf16>
    %69 = vector.shape_cast %68 : vector<16x8xbf16> to vector<2x8x8xbf16>
    %70 = vector.extract_strided_slice %15 {offsets = [0, 16], sizes = [16, 8], strides = [1, 1]} : vector<16x32xbf16> to vector<16x8xbf16>
    %71 = vector.shape_cast %70 : vector<16x8xbf16> to vector<2x8x8xbf16>
    "tpu.trace_start"() <{level = 10 : i32, message = "bqd,bkd->bqk"}> : () -> ()
    %cst_20 = arith.constant dense<0.000000e+00> : vector<2x8x8xf32>
    %72 = tpu.matmul %67, %69, %cst_20 {dimension_numbers = #tpu.dot_dimension_numbers<[2], [2], [1], [1], [0, 0, 0, 1, 1, 1], [0], [0]>} : vector<2x8x8xbf16>, vector<2x8x8xbf16>, vector<2x8x8xf32> -> vector<2x8x8xf32>
    "tpu.trace_stop"() : () -> ()
    %cst_21 = arith.constant dense<0xFF800000> : vector<2x8xf32>
    %73 = vector.multi_reduction <maximumf>, %72, %cst_21 [2] : vector<2x8x8xf32> to vector<2x8xf32>
    %74 = vector.shape_cast %73 : vector<2x8xf32> to vector<2x8x1xf32>
    %75 = vector.broadcast %74 : vector<2x8x1xf32> to vector<2x8x8xf32>
    %76 = arith.subf %72, %75 : vector<2x8x8xf32>
    %77 = math.exp %76 : vector<2x8x8xf32>
    %cst_22 = arith.constant dense<0.000000e+00> : vector<2x8xf32>
    %78 = vector.multi_reduction <add>, %77, %cst_22 [2] : vector<2x8x8xf32> to vector<2x8xf32>
    %79 = vector.shape_cast %78 : vector<2x8xf32> to vector<2x8x1xf32>
    %80 = tpu.reciprocal %79 {approx = true} : vector<2x8x1xf32> -> vector<2x8x1xf32>
    %81 = vector.broadcast %80 : vector<2x8x1xf32> to vector<2x8x8xf32>
    %82 = arith.mulf %77, %81 : vector<2x8x8xf32>
    %83 = arith.truncf %82 : vector<2x8x8xf32> to vector<2x8x8xbf16>
    "tpu.trace_start"() <{level = 10 : i32, message = "bqk,bkd->bqd"}> : () -> ()
    %cst_23 = arith.constant dense<0.000000e+00> : vector<2x8x8xf32>
    %84 = tpu.matmul %83, %71, %cst_23 {dimension_numbers = #tpu.dot_dimension_numbers<[2], [1], [1], [2], [0, 0, 0, 1, 1, 2], [0], [0]>} : vector<2x8x8xbf16>, vector<2x8x8xbf16>, vector<2x8x8xf32> -> vector<2x8x8xf32>
    "tpu.trace_stop"() : () -> ()
    %85 = vector.shape_cast %84 : vector<2x8x8xf32> to vector<16x8xf32>
    %86 = arith.truncf %85 : vector<16x8xf32> to vector<16x8xbf16>
    %87 = vector.extract_strided_slice %16 {offsets = [16, 0], sizes = [8, 32], strides = [1, 1]} : vector<32x32xbf16> to vector<8x32xbf16>
    %cst_24 = arith.constant dense<0.000000e+00> : vector<16x32xf32>
    %88 = tpu.matmul %86, %87, %cst_24 {dimension_numbers = #tpu.dot_dimension_numbers<[1], [0], [0], [1], [0, 0, 1, 1], [], []>} : vector<16x8xbf16>, vector<8x32xbf16>, vector<16x32xf32> -> vector<16x32xf32>
    %89 = arith.addf %65, %88 : vector<16x32xf32>
    %90 = vector.extract_strided_slice %11 {offsets = [0, 24], sizes = [16, 8], strides = [1, 1]} : vector<16x32xbf16> to vector<16x8xbf16>
    %91 = vector.shape_cast %90 : vector<16x8xbf16> to vector<2x8x8xbf16>
    %92 = vector.extract_strided_slice %13 {offsets = [0, 24], sizes = [16, 8], strides = [1, 1]} : vector<16x32xbf16> to vector<16x8xbf16>
    %93 = vector.shape_cast %92 : vector<16x8xbf16> to vector<2x8x8xbf16>
    %94 = vector.extract_strided_slice %15 {offsets = [0, 24], sizes = [16, 8], strides = [1, 1]} : vector<16x32xbf16> to vector<16x8xbf16>
    %95 = vector.shape_cast %94 : vector<16x8xbf16> to vector<2x8x8xbf16>
    "tpu.trace_start"() <{level = 10 : i32, message = "bqd,bkd->bqk"}> : () -> ()
    %cst_25 = arith.constant dense<0.000000e+00> : vector<2x8x8xf32>
    %96 = tpu.matmul %91, %93, %cst_25 {dimension_numbers = #tpu.dot_dimension_numbers<[2], [2], [1], [1], [0, 0, 0, 1, 1, 1], [0], [0]>} : vector<2x8x8xbf16>, vector<2x8x8xbf16>, vector<2x8x8xf32> -> vector<2x8x8xf32>
    "tpu.trace_stop"() : () -> ()
    %cst_26 = arith.constant dense<0xFF800000> : vector<2x8xf32>
    %97 = vector.multi_reduction <maximumf>, %96, %cst_26 [2] : vector<2x8x8xf32> to vector<2x8xf32>
    %98 = vector.shape_cast %97 : vector<2x8xf32> to vector<2x8x1xf32>
    %99 = vector.broadcast %98 : vector<2x8x1xf32> to vector<2x8x8xf32>
    %100 = arith.subf %96, %99 : vector<2x8x8xf32>
    %101 = math.exp %100 : vector<2x8x8xf32>
    %cst_27 = arith.constant dense<0.000000e+00> : vector<2x8xf32>
    %102 = vector.multi_reduction <add>, %101, %cst_27 [2] : vector<2x8x8xf32> to vector<2x8xf32>
    %103 = vector.shape_cast %102 : vector<2x8xf32> to vector<2x8x1xf32>
    %104 = tpu.reciprocal %103 {approx = true} : vector<2x8x1xf32> -> vector<2x8x1xf32>
    %105 = vector.broadcast %104 : vector<2x8x1xf32> to vector<2x8x8xf32>
    %106 = arith.mulf %101, %105 : vector<2x8x8xf32>
    %107 = arith.truncf %106 : vector<2x8x8xf32> to vector<2x8x8xbf16>
    "tpu.trace_start"() <{level = 10 : i32, message = "bqk,bkd->bqd"}> : () -> ()
    %cst_28 = arith.constant dense<0.000000e+00> : vector<2x8x8xf32>
    %108 = tpu.matmul %107, %95, %cst_28 {dimension_numbers = #tpu.dot_dimension_numbers<[2], [1], [1], [2], [0, 0, 0, 1, 1, 2], [0], [0]>} : vector<2x8x8xbf16>, vector<2x8x8xbf16>, vector<2x8x8xf32> -> vector<2x8x8xf32>
    "tpu.trace_stop"() : () -> ()
    %109 = vector.shape_cast %108 : vector<2x8x8xf32> to vector<16x8xf32>
    %110 = arith.truncf %109 : vector<16x8xf32> to vector<16x8xbf16>
    %111 = vector.extract_strided_slice %16 {offsets = [24, 0], sizes = [8, 32], strides = [1, 1]} : vector<32x32xbf16> to vector<8x32xbf16>
    %cst_29 = arith.constant dense<0.000000e+00> : vector<16x32xf32>
    %112 = tpu.matmul %110, %111, %cst_29 {dimension_numbers = #tpu.dot_dimension_numbers<[1], [0], [0], [1], [0, 0, 1, 1], [], []>} : vector<16x8xbf16>, vector<8x32xbf16>, vector<16x32xf32> -> vector<16x32xf32>
    %113 = arith.addf %89, %112 : vector<16x32xf32>
    %c0_30 = arith.constant 0 : index
    %c0_31 = arith.constant 0 : index
    %114 = vector.load %arg5[%c0_30, %c0_31] : memref<1x32xf32, #tpu.memory_space<vmem>>, vector<1x32xf32>
    %115 = vector.broadcast %114 : vector<1x32xf32> to vector<16x32xf32>
    %116 = arith.addf %113, %115 : vector<16x32xf32>
    %117 = arith.addf %2, %116 : vector<16x32xf32>
    %c0_32 = arith.constant 0 : index
    %c0_33 = arith.constant 0 : index
    %118 = vector.load %arg6[%c0_32, %c0_33] : memref<1x32xf32, #tpu.memory_space<vmem>>, vector<1x32xf32>
    %c0_34 = arith.constant 0 : index
    %c0_35 = arith.constant 0 : index
    %119 = vector.load %arg7[%c0_34, %c0_35] : memref<1x32xf32, #tpu.memory_space<vmem>>, vector<1x32xf32>
    %cst_36 = arith.constant dense<0.000000e+00> : vector<16xf32>
    %120 = vector.multi_reduction <add>, %117, %cst_36 [1] : vector<16x32xf32> to vector<16xf32>
    %121 = vector.shape_cast %120 : vector<16xf32> to vector<16x1xf32>
    %cst_37 = arith.constant 3.200000e+01 : f32
    %122 = vector.broadcast %cst_37 : f32 to vector<16x1xf32>
    %123 = arith.divf %121, %122 : vector<16x1xf32>
    %124 = vector.broadcast %123 : vector<16x1xf32> to vector<16x32xf32>
    %125 = arith.subf %117, %124 : vector<16x32xf32>
    %126 = arith.mulf %125, %125 : vector<16x32xf32>
    %cst_38 = arith.constant dense<0.000000e+00> : vector<16xf32>
    %127 = vector.multi_reduction <add>, %126, %cst_38 [1] : vector<16x32xf32> to vector<16xf32>
    %128 = vector.shape_cast %127 : vector<16xf32> to vector<16x1xf32>
    %cst_39 = arith.constant 3.200000e+01 : f32
    %129 = vector.broadcast %cst_39 : f32 to vector<16x1xf32>
    %130 = arith.divf %128, %129 : vector<16x1xf32>
    %131 = vector.broadcast %123 : vector<16x1xf32> to vector<16x32xf32>
    %132 = arith.subf %117, %131 : vector<16x32xf32>
    %cst_40 = arith.constant 9.99999974E-6 : f32
    %133 = vector.broadcast %cst_40 : f32 to vector<16x1xf32>
    %134 = arith.addf %130, %133 : vector<16x1xf32>
    %135 = math.rsqrt %134 : vector<16x1xf32>
    %136 = vector.broadcast %135 : vector<16x1xf32> to vector<16x32xf32>
    %137 = arith.mulf %132, %136 : vector<16x32xf32>
    %138 = vector.broadcast %118 : vector<1x32xf32> to vector<16x32xf32>
    %139 = arith.mulf %137, %138 : vector<16x32xf32>
    %140 = vector.broadcast %119 : vector<1x32xf32> to vector<16x32xf32>
    %141 = arith.addf %139, %140 : vector<16x32xf32>
    %142 = arith.truncf %141 : vector<16x32xf32> to vector<16x32xbf16>
    %c0_41 = arith.constant 0 : index
    %c0_42 = arith.constant 0 : index
    %143 = vector.load %arg10[%c0_41, %c0_42] : memref<32x128xbf16, #tpu.memory_space<vmem>>, vector<32x128xbf16>
    %cst_43 = arith.constant dense<0.000000e+00> : vector<16x128xf32>
    %144 = tpu.matmul %142, %143, %cst_43 {dimension_numbers = #tpu.dot_dimension_numbers<[1], [0], [0], [1], [0, 0, 1, 1], [], []>} : vector<16x32xbf16>, vector<32x128xbf16>, vector<16x128xf32> -> vector<16x128xf32>
    %c0_44 = arith.constant 0 : index
    %c0_45 = arith.constant 0 : index
    %145 = vector.load %arg11[%c0_44, %c0_45] : memref<1x128xf32, #tpu.memory_space<vmem>>, vector<1x128xf32>
    %146 = vector.broadcast %145 : vector<1x128xf32> to vector<16x128xf32>
    %147 = arith.addf %144, %146 : vector<16x128xf32>
    %cst_46 = arith.constant 5.000000e-01 : f32
    %148 = vector.broadcast %cst_46 : f32 to vector<16x128xf32>
    %149 = arith.mulf %148, %147 : vector<16x128xf32>
    %cst_47 = arith.constant 0.707106769 : f32
    %150 = vector.broadcast %cst_47 : f32 to vector<16x128xf32>
    %151 = arith.mulf %147, %150 : vector<16x128xf32>
    %152 = math.absf %151 : vector<16x128xf32>
    %cst_48 = arith.constant 0.327591091 : f32
    %153 = vector.broadcast %cst_48 : f32 to vector<16x128xf32>
    %154 = arith.mulf %153, %152 : vector<16x128xf32>
    %cst_49 = arith.constant 1.000000e+00 : f32
    %155 = vector.broadcast %cst_49 : f32 to vector<16x128xf32>
    %156 = arith.addf %155, %154 : vector<16x128xf32>
    %cst_50 = arith.constant 1.000000e+00 : f32
    %157 = vector.broadcast %cst_50 : f32 to vector<16x128xf32>
    %158 = arith.divf %157, %156 : vector<16x128xf32>
    %cst_51 = arith.constant 1.06140542 : f32
    %159 = vector.broadcast %cst_51 : f32 to vector<16x128xf32>
    %160 = arith.mulf %159, %158 : vector<16x128xf32>
    %cst_52 = arith.constant -1.45315206 : f32
    %161 = vector.broadcast %cst_52 : f32 to vector<16x128xf32>
    %162 = arith.addf %160, %161 : vector<16x128xf32>
    %163 = arith.mulf %162, %158 : vector<16x128xf32>
    %cst_53 = arith.constant 1.42141378 : f32
    %164 = vector.broadcast %cst_53 : f32 to vector<16x128xf32>
    %165 = arith.addf %163, %164 : vector<16x128xf32>
    %166 = arith.mulf %165, %158 : vector<16x128xf32>
    %cst_54 = arith.constant -0.284496725 : f32
    %167 = vector.broadcast %cst_54 : f32 to vector<16x128xf32>
    %168 = arith.addf %166, %167 : vector<16x128xf32>
    %169 = arith.mulf %168, %158 : vector<16x128xf32>
    %cst_55 = arith.constant 0.254829586 : f32
    %170 = vector.broadcast %cst_55 : f32 to vector<16x128xf32>
    %171 = arith.addf %169, %170 : vector<16x128xf32>
    %172 = arith.mulf %171, %158 : vector<16x128xf32>
    %cst_56 = arith.constant 0.000000e+00 : f32
    %173 = vector.broadcast %cst_56 : f32 to vector<16x128xf32>
    %174 = arith.subf %173, %152 : vector<16x128xf32>
    %175 = arith.mulf %174, %152 : vector<16x128xf32>
    %176 = math.exp %175 : vector<16x128xf32>
    %177 = arith.mulf %172, %176 : vector<16x128xf32>
    %cst_57 = arith.constant 1.000000e+00 : f32
    %178 = vector.broadcast %cst_57 : f32 to vector<16x128xf32>
    %179 = arith.subf %178, %177 : vector<16x128xf32>
    %cst_58 = arith.constant 0.000000e+00 : f32
    %180 = vector.broadcast %cst_58 : f32 to vector<16x128xf32>
    %181 = arith.cmpf oge, %151, %180 : vector<16x128xf32>
    %cst_59 = arith.constant 0.000000e+00 : f32
    %182 = vector.broadcast %cst_59 : f32 to vector<16x128xf32>
    %183 = arith.subf %182, %179 : vector<16x128xf32>
    %184 = arith.select %181, %179, %183 : vector<16x128xi1>, vector<16x128xf32>
    %cst_60 = arith.constant 1.000000e+00 : f32
    %185 = vector.broadcast %cst_60 : f32 to vector<16x128xf32>
    %186 = arith.addf %185, %184 : vector<16x128xf32>
    %187 = arith.mulf %149, %186 : vector<16x128xf32>
    %188 = arith.truncf %187 : vector<16x128xf32> to vector<16x128xbf16>
    %c0_61 = arith.constant 0 : index
    %c0_62 = arith.constant 0 : index
    %189 = vector.load %arg12[%c0_61, %c0_62] : memref<128x32xbf16, #tpu.memory_space<vmem>>, vector<128x32xbf16>
    %cst_63 = arith.constant dense<0.000000e+00> : vector<16x32xf32>
    %190 = tpu.matmul %188, %189, %cst_63 {dimension_numbers = #tpu.dot_dimension_numbers<[1], [0], [0], [1], [0, 0, 1, 1], [], []>} : vector<16x128xbf16>, vector<128x32xbf16>, vector<16x32xf32> -> vector<16x32xf32>
    %c0_64 = arith.constant 0 : index
    %c0_65 = arith.constant 0 : index
    %191 = vector.load %arg13[%c0_64, %c0_65] : memref<1x32xf32, #tpu.memory_space<vmem>>, vector<1x32xf32>
    %192 = vector.broadcast %191 : vector<1x32xf32> to vector<16x32xf32>
    %193 = arith.addf %190, %192 : vector<16x32xf32>
    %194 = arith.addf %141, %193 : vector<16x32xf32>
    %c0_66 = arith.constant 0 : index
    %c0_67 = arith.constant 0 : index
    %195 = vector.load %arg8[%c0_66, %c0_67] : memref<1x32xf32, #tpu.memory_space<vmem>>, vector<1x32xf32>
    %c0_68 = arith.constant 0 : index
    %c0_69 = arith.constant 0 : index
    %196 = vector.load %arg9[%c0_68, %c0_69] : memref<1x32xf32, #tpu.memory_space<vmem>>, vector<1x32xf32>
    %cst_70 = arith.constant dense<0.000000e+00> : vector<16xf32>
    %197 = vector.multi_reduction <add>, %194, %cst_70 [1] : vector<16x32xf32> to vector<16xf32>
    %198 = vector.shape_cast %197 : vector<16xf32> to vector<16x1xf32>
    %cst_71 = arith.constant 3.200000e+01 : f32
    %199 = vector.broadcast %cst_71 : f32 to vector<16x1xf32>
    %200 = arith.divf %198, %199 : vector<16x1xf32>
    %201 = vector.broadcast %200 : vector<16x1xf32> to vector<16x32xf32>
    %202 = arith.subf %194, %201 : vector<16x32xf32>
    %203 = arith.mulf %202, %202 : vector<16x32xf32>
    %cst_72 = arith.constant dense<0.000000e+00> : vector<16xf32>
    %204 = vector.multi_reduction <add>, %203, %cst_72 [1] : vector<16x32xf32> to vector<16xf32>
    %205 = vector.shape_cast %204 : vector<16xf32> to vector<16x1xf32>
    %cst_73 = arith.constant 3.200000e+01 : f32
    %206 = vector.broadcast %cst_73 : f32 to vector<16x1xf32>
    %207 = arith.divf %205, %206 : vector<16x1xf32>
    %208 = vector.broadcast %200 : vector<16x1xf32> to vector<16x32xf32>
    %209 = arith.subf %194, %208 : vector<16x32xf32>
    %cst_74 = arith.constant 9.99999974E-6 : f32
    %210 = vector.broadcast %cst_74 : f32 to vector<16x1xf32>
    %211 = arith.addf %207, %210 : vector<16x1xf32>
    %212 = math.rsqrt %211 : vector<16x1xf32>
    %213 = vector.broadcast %212 : vector<16x1xf32> to vector<16x32xf32>
    %214 = arith.mulf %209, %213 : vector<16x32xf32>
    %215 = vector.broadcast %195 : vector<1x32xf32> to vector<16x32xf32>
    %216 = arith.mulf %214, %215 : vector<16x32xf32>
    %217 = vector.broadcast %196 : vector<1x32xf32> to vector<16x32xf32>
    %218 = arith.addf %216, %217 : vector<16x32xf32>
    %219 = vector.shape_cast %218 : vector<16x32xf32> to vector<2x8x32xf32>
    %220 = arith.truncf %219 : vector<2x8x32xf32> to vector<2x8x32xbf16>
    %c0_75 = arith.constant 0 : index
    %c0_76 = arith.constant 0 : index
    %c0_77 = arith.constant 0 : index
    %221 = vector.load %arg14[%c0_75, %c0_76, %c0_77] : memref<2x8x32xbf16, #tpu.memory_space<vmem>>, vector<2x8x32xbf16>
    tpu.vector_store %arg14[%c0_75, %c0_76, %c0_77], %220 {strides = array<i32>} : memref<2x8x32xbf16, #tpu.memory_space<vmem>>, vector<2x8x32xbf16>,
    return
  }
  func.func @transform_0(%arg0: i32) -> (i32, i32, i32) {
    %c0_i32 = arith.constant 0 : i32
    %c0_i32_0 = arith.constant 0 : i32
    %c0_i32_1 = arith.constant 0 : i32
    return %arg0, %c0_i32, %c0_i32_0 : i32, i32, i32
  }
  func.func @transform_1(%arg0: i32) -> (i32, i32) {
    %c0_i32 = arith.constant 0 : i32
    %c0_i32_0 = arith.constant 0 : i32
    %c0_i32_1 = arith.constant 0 : i32
    return %c0_i32, %c0_i32_0 : i32, i32
  }
  func.func @transform_2(%arg0: i32) -> (i32, i32) {
    %c0_i32 = arith.constant 0 : i32
    %c0_i32_0 = arith.constant 0 : i32
    %c0_i32_1 = arith.constant 0 : i32
    return %c0_i32, %c0_i32_0 : i32, i32
  }
  func.func @transform_3(%arg0: i32) -> (i32, i32) {
    %c0_i32 = arith.constant 0 : i32
    %c0_i32_0 = arith.constant 0 : i32
    %c0_i32_1 = arith.constant 0 : i32
    return %c0_i32, %c0_i32_0 : i32, i32
  }
  func.func @transform_4(%arg0: i32) -> (i32, i32) {
    %c0_i32 = arith.constant 0 : i32
    %c0_i32_0 = arith.constant 0 : i32
    %c0_i32_1 = arith.constant 0 : i32
    return %c0_i32, %c0_i32_0 : i32, i32
  }
  func.func @transform_5(%arg0: i32) -> (i32, i32) {
    %c0_i32 = arith.constant 0 : i32
    %c0_i32_0 = arith.constant 0 : i32
    %c0_i32_1 = arith.constant 0 : i32
    return %c0_i32, %c0_i32_0 : i32, i32
  }
  func.func @transform_6(%arg0: i32) -> (i32, i32) {
    %c0_i32 = arith.constant 0 : i32
    %c0_i32_0 = arith.constant 0 : i32
    %c0_i32_1 = arith.constant 0 : i32
    return %c0_i32, %c0_i32_0 : i32, i32
  }
  func.func @transform_7(%arg0: i32) -> (i32, i32) {
    %c0_i32 = arith.constant 0 : i32
    %c0_i32_0 = arith.constant 0 : i32
    %c0_i32_1 = arith.constant 0 : i32
    return %c0_i32, %c0_i32_0 : i32, i32
  }
  func.func @transform_8(%arg0: i32) -> (i32, i32) {
    %c0_i32 = arith.constant 0 : i32
    %c0_i32_0 = arith.constant 0 : i32
    %c0_i32_1 = arith.constant 0 : i32
    return %c0_i32, %c0_i32_0 : i32, i32
  }
  func.func @transform_9(%arg0: i32) -> (i32, i32) {
    %c0_i32 = arith.constant 0 : i32
    %c0_i32_0 = arith.constant 0 : i32
    %c0_i32_1 = arith.constant 0 : i32
    return %c0_i32, %c0_i32_0 : i32, i32
  }
  func.func @transform_10(%arg0: i32) -> (i32, i32) {
    %c0_i32 = arith.constant 0 : i32
    %c0_i32_0 = arith.constant 0 : i32
    %c0_i32_1 = arith.constant 0 : i32
    return %c0_i32, %c0_i32_0 : i32, i32
  }
  func.func @transform_11(%arg0: i32) -> (i32, i32) {
    %c0_i32 = arith.constant 0 : i32
    %c0_i32_0 = arith.constant 0 : i32
    %c0_i32_1 = arith.constant 0 : i32
    return %c0_i32, %c0_i32_0 : i32, i32
  }
  func.func @transform_12(%arg0: i32) -> (i32, i32) {
    %c0_i32 = arith.constant 0 : i32
    %c0_i32_0 = arith.constant 0 : i32
    %c0_i32_1 = arith.constant 0 : i32
    return %c0_i32, %c0_i32_0 : i32, i32
  }
  func.func @transform_13(%arg0: i32) -> (i32, i32, i32) {
    %c0_i32 = arith.constant 0 : i32
    %c0_i32_0 = arith.constant 0 : i32
    %c0_i32_1 = arith.constant 0 : i32
    return %arg0, %c0_i32, %c0_i32_0 : i32, i32, i32
  }
}

</mosaic_0001>

<bundles_post_ra>
// kernel: tpu_custom_call.1
= control target key start
LH: loop header
LB: loop body
LE: loop exit
PB: predicated region body
PF: predicated region fallthrough
CT: control target
= control target key end

     0   :  { %s1497_s0 = inlined_call_operand.vmem [shape: bf16[2,8,32], index: 0, kind: input, shape index: {}]   ;;  %s1498_s1 = inlined_call_operand.vmem [shape: bf16[32,96], index: 1, kind: input, shape index: {}]   ;;  %s1499_s2 = inlined_call_operand.vmem [shape: f32[1,96], index: 2, kind: input, shape index: {}]   ;;  %s1500_s3 = inlined_call_operand.vmem [shape: bf16[32,32], index: 3, kind: input, shape index: {}]   ;;  %s1501_s4 = inlined_call_operand.vmem [shape: f32[1,32], index: 4, kind: input, shape index: {}]   ;;  %s1502_s5 = inlined_call_operand.vmem [shape: f32[1,32], index: 5, kind: input, shape index: {}]   ;;  %s1503_s6 = inlined_call_operand.vmem [shape: f32[1,32], index: 6, kind: input, shape index: {}]   ;;  %s1504_s7 = inlined_call_operand.vmem [shape: f32[1,32], index: 7, kind: input, shape index: {}]   ;;  %s1505_s8 = inlined_call_operand.vmem [shape: f32[1,32], index: 8, kind: input, shape index: {}]   ;;  %s1506_s9 = inlined_call_operand.vmem [shape: bf16[32,128], index: 9, kind: input, shape index: {}]   ;;  %s1507_s10 = inlined_call_operand.vmem [shape: f32[1,128], index: 10, kind: input, shape index: {}]   ;;  %s1508_s11 = inlined_call_operand.vmem [shape: bf16[128,32], index: 11, kind: input, shape index: {}]   ;;  %s1509_s12 = inlined_call_operand.vmem [shape: f32[1,32], index: 12, kind: input, shape index: {}]   ;;  %s1510_s13 = inlined_call_operand.hbm [shape: bf16[2,8,32], index: 13, kind: output, shape index: {}]  }
   0x1   :  { %v1078_v0 = vld [vmem:[%s1498_s1 + $0x8] sm:$0xff]  ;;  %v1077_v1 = vld [vmem:[%s1498_s1] sm:$0xff] }
   0x2   :  { %85 = vmatpush.bf16.msra.mxu0 %v1078_v0 }
   0x3   :  { %18 = vsyncpa [#allocation3], 0  ;;  %v1076_v2 = vld [vmem:[%s1497_s0] sm:$0xff]  ;;  %vm75_vm0 = vcmask 261120   ;;  %s1187_s1 = smov 96   ;;  %s1188_s16 = smov 88  }
   0x4   :  { %v1103_v3 = vld [vmem:[%s1499_s2] ss:$0 sm:$0xff]  ;;  %s1189_s2 = smov 120   ;;  %s1190_s17 = smov 56   ;;  %vm108_vm1 = vcmask 64512   ;;  %vm181_vm2 = vcmask 1043456  }
   0x5   :  { %s1191_s18 = smov 80   ;;  %s1192_s19 = smov 64  }
   0x6   :  { %86 = vmatpush.bf16.msra.mxu0 %v1077_v1  ;;  %s1193_s20 = smov 112   ;;  %s1194_s21 = smov 48  }
   0x7   :  { %s1195_s22 = smov 72   ;;  %s1196_s27 = smov 104  }
   0x8   :  { %s1197_s28 = smov 40  }
   0x9   :  { %1014 = vmatmul.msk.bf16.vlgmr.msra.gmra.mxu0 %vm75_vm0, %v1076_v2 }
  0x86   :  { %v88_v4 = vpop.f32.mrf.mxu0 }
  0x87   :  { %v89_v5 = vadd.f32 %v1103_v3, %v88_v4 }
  0x89   :  { %v97_v6 = vpack.c.bf16 %v89_v5, %v89_v5  ;;  %v93_v7 = vmul.f32 0.35355338, %v89_v5 }
  0x8b   :  { %v104_v8 = vunpack.c.l.b16 %v97_v6  ;;  %v95_v10 = vpack.c.bf16 %v93_v7, %v93_v7 }
  0x8d   :  { %v1284_v9 = vpack.c.b16 %v104_v8, %v104_v8  ;;  %v221_v15 = vunpack.c.l.b16 %v95_v10 }
  0x8e   :  { %v90_v11 = vpop.f32.mrf.mxu0 }
  0x8f   :  { %v91_v12 = vadd.f32 %v1103_v3, %v90_v11  ;;  %106 = vrot.lane.b32.xlu1 %v1284_v9, %s1187_s1  ;;  %225 = vrot.lane.b32.xlu0 %v1284_v9, %s1188_s16  ;;  %v1290_v19 = vpack.c.b16 %v221_v15, %v221_v15  ;;  %v100_v11 = vld [vmem:[%s1500_s3 + $0x4] sm:$0xf] }
  0x91   :  { %v94_v13 = vmul.f32 0.35355338, %v91_v12  ;;  %v98_v14 = vpack.c.bf16 %v91_v12, %v91_v12  ;;  %v343_v12 = vsel %vm181_vm2, %v100_v11, 0 }
  0x93   :  { %v129_v16 = vunpack.c.l.b16 %v98_v14  ;;  %v96_v17 = vpack.c.bf16 %v94_v13, %v94_v13 }
  0x95   :  { %v1288_v18 = vpack.c.b16 %v129_v16, %v129_v16  ;;  %v247_v20 = vunpack.c.l.b16 %v96_v17 }
  0x97   :  { %251 = vrot.lane.b32.xlu2 %v1288_v18, %s1188_s16  ;;  %131 = vrot.lane.b32.xlu1 %v1288_v18, %s1187_s1  ;;  %v1295_v21 = vpack.c.b16 %v247_v20, %v247_v20 }
  0x98   :  { %223 = vrot.lane.b32.xlu0 %v1290_v19, %s1189_s2 }
  0x9f   :  { %249 = vrot.lane.b32.xlu2 %v1295_v21, %s1189_s2 }
  0xa7   :  { %296 = vrot.lane.b32.xlu2 %v1284_v9, %s1190_s17 }
  0xf1   :  { %v252_v22 = vpop.permute.xlu2 %251 }
  0xf2   :  { %v257_v23 = vsel %vm108_vm1, %v252_v22, 0 }
  0xf3   :  { %266 = vmatpush.bf16.xpose.msra.mxu1 %v257_v23 }
  0xf9   :  { %v250_v24 = vpop.permute.xlu2 %249 }
  0xfa   :  { %1020 = vmatmul.msk.bf16.vlgmr.msra.gmra.mxu1 %vm108_vm1, %v250_v24 }
 0x101   :  { %v107_v25 = vpop.permute.xlu1 %106  ;;  %v226_v26 = vpop.permute.xlu0 %225 }
 0x102   :  { %v113_v27 = vsel %vm108_vm1, %v107_v25, 0  ;;  %v231_v28 = vsel %vm108_vm1, %v226_v26, 0  ;;  %v297_v29 = vpop.permute.xlu2 %296 }
 0x103   :  { %122 = vmatpush.bf16.xpose.msra.mxu2 %v113_v27  ;;  %240 = vmatpush.bf16.xpose.msrb.mxu0 %v231_v28  ;;  %v302_v33 = vsel %vm181_vm2, %v297_v29, 0 }
 0x109   :  { %v132_v30 = vpop.permute.xlu1 %131 }
 0x10a   :  { %v224_v31 = vpop.permute.xlu0 %223  ;;  %1015 = vmatmul.msk.bf16.vlgmr.msra.gmra.mxu2 %vm108_vm1, %v95_v10  ;;  %v137_v32 = vsel %vm108_vm1, %v132_v30, 0 }
 0x10b   :  { %1019 = vmatmul.msk.bf16.vlgmr.msrb.gmra.mxu0 %vm108_vm1, %v224_v31  ;;  %146 = vmatpush.bf16.xpose.msrb.mxu2 %v137_v32 }
 0x10c   :  { %352 = vmatpush.bf16.msra.mxu0 %v343_v12 }
 0x113   :  { %311 = vmatpush.bf16.msra.mxu2 %v302_v33 }
 0x11a   :  { %1016 = vmatmul.msk.bf16.vlgmr.msrb.gmra.mxu2 %vm108_vm1, %v96_v17 }
 0x177   :  { %v268_v34 = vpop.f32.mrf.mxu1 }
 0x178   :  { %v275_v45 = vsel %vm108_vm1, %v268_v34, -inf }
 0x17f   :  { %v270_v35 = vpop.f32.mrf.mxu1 }
 0x188   :  { %v242_v36 = vpop.f32.mrf.mxu0 }
 0x189   :  { %v272_v37 = vsel %vm108_vm1, %v242_v36, -inf }
 0x18a   :  { %273 = vmax.xlane.f32.xlu0 %v272_v37 }
 0x18d   :  { %v124_v38 = vpop.f32.mrf.mxu2 }
 0x18e   :  { %v152_v39 = vsel %vm108_vm1, %v124_v38, -inf }
 0x18f   :  { %153 = vmax.xlane.f32.xlu2 %v152_v39 }
 0x190   :  { %v244_v40 = vpop.f32.mrf.mxu0 }
 0x195   :  { %v126_v41 = vpop.f32.mrf.mxu2 }
 0x19d   :  { %v148_v42 = vpop.f32.mrf.mxu2 }
 0x19e   :  { %381 = vrot.lane.b32.xlu0 %v1284_v9, %s1191_s18  ;;  %v155_v43 = vsel %vm108_vm1, %v148_v42, -inf }
 0x19f   :  { %156 = vmax.xlane.f32.xlu2 %v155_v43 }
 0x1a5   :  { %v150_v44 = vpop.f32.mrf.mxu2 }
 0x1a7   :  { %276 = vmax.xlane.f32.xlu2 %v275_v45 }
 0x1bf   :  { %176 = vrot.lane.b32.xlu2 %v1284_v9, %s1192_s19 }
 0x1c7   :  { %198 = vrot.lane.b32.xlu2 %v1288_v18, %s1192_s19 }
 0x1fd   :  { %v274_v46 = vpop.xlane.xlu0 %273 }
 0x1fe   :  { %v278_v47 = vsub.f32 %v242_v36, %v274_v46 }
 0x200   :  { %v280_v48 = vmul.f32 1.442695, %v278_v47  ;;  %v99_v47 = vld [vmem:[%s1500_s3] sm:$0xf] }
 0x202   :  { %1111 = vpow2.f32 %v280_v48  ;;  %v154_v49 = vpop.xlane.xlu2 %153  ;;  %v363_v48 = vsel %vm181_vm2, %v99_v47, 0 }
 0x203   :  { %v158_v50 = vsub.f32 %v124_v38, %v154_v49  ;;  %372 = vmatpush.bf16.msrb.mxu1 %v363_v48 }
 0x205   :  { %v160_v51 = vmul.f32 1.442695, %v158_v50 }
 0x207   :  { %1113 = vpow2.f32 %v160_v51 }
 0x208   :  { %v1112_v52 = vpop.eup %1111 }
 0x209   :  { %v284_v53 = vsel %vm108_vm1, %v1112_v52, 0.0 }
 0x20a   :  { %285 = vadd.xlane.f32.xlu1 %v284_v53 }
 0x20d   :  { %v1114_v54 = vpop.eup %1113 }
 0x20e   :  { %v164_v55 = vsel %vm108_vm1, %v1114_v54, 0.0 }
 0x20f   :  { %165 = vadd.xlane.f32.xlu0 %v164_v55 }
 0x210   :  { %v382_v56 = vpop.permute.xlu0 %381 }
 0x211   :  { %v387_v57 = vsel %vm108_vm1, %v382_v56, 0 }
 0x212   :  { %396 = vmatpush.bf16.xpose.msrb.mxu2 %v387_v57  ;;  %v157_v58 = vpop.xlane.xlu2 %156 }
 0x213   :  { %v159_v4 = vsub.f32 %v148_v42, %v157_v58 }
 0x215   :  { %v162_v5 = vmul.f32 1.442695, %v159_v4 }
 0x21a   :  { %v277_v59 = vpop.xlane.xlu2 %276 }
 0x21b   :  { %v279_v60 = vsub.f32 %v268_v34, %v277_v59 }
 0x21d   :  { %v282_v61 = vmul.f32 1.442695, %v279_v60 }
 0x21f   :  { %1115 = vpow2.f32 %v282_v61 }
 0x220   :  { %1117 = vpow2.f32 %v162_v5 }
 0x222   :  { %v177_v62 = vpop.permute.xlu2 %176 }
 0x223   :  { %379 = vrot.lane.b32.xlu1 %v1290_v19, %s1193_s20  ;;  %317 = vrot.lane.b32.xlu0 %v1288_v18, %s1190_s17  ;;  %v183_v63 = vsel %vm181_vm2, %v177_v62, 0 }
 0x224   :  { %192 = vmatpush.bf16.msra.mxu3 %v183_v63 }
 0x225   :  { %v1116_v0 = vpop.eup %1115 }
 0x226   :  { %v287_v1 = vsel %vm108_vm1, %v1116_v0, 0.0  ;;  %v1118_v6 = vpop.eup %1117 }
 0x227   :  { %288 = vadd.xlane.f32.xlu2 %v287_v1  ;;  %v167_v7 = vsel %vm108_vm1, %v1118_v6, 0.0 }
 0x22a   :  { %v199_v2 = vpop.permute.xlu2 %198 }
 0x22b   :  { %402 = vrot.lane.b32.xlu0 %v1295_v21, %s1193_s20  ;;  %v204_v3 = vsel %vm181_vm2, %v199_v2, 0 }
 0x22c   :  { %213 = vmatpush.bf16.msrb.mxu3 %v204_v3 }
 0x23f   :  { %449 = vrot.lane.b32.xlu2 %v1284_v9, %s1194_s21 }
 0x247   :  { %516 = vrot.lane.b32.xlu2 %v1284_v9, %s1195_s22 }
 0x24d   :  { %168 = vadd.xlane.f32.xlu1 %v167_v7 }
 0x24f   :  { %539 = vrot.lane.b32.xlu2 %v1288_v18, %s1195_s22 }
 0x266   :  { %404 = vrot.lane.b32.xlu1 %v1288_v18, %s1191_s18 }
 0x27d   :  { %v286_v8 = vpop.xlane.xlu1 %285 }
 0x27e   :  { %1119 = vrcp.f32 %v286_v8 }
 0x282   :  { %v166_v10 = vpop.xlane.xlu0 %165 }
 0x283   :  { %1121 = vrcp.f32 %v166_v10 }
 0x284   :  { %v1120_v13 = vpop.eup %1119 }
 0x285   :  { %v292_v14 = vmul.f32 %v1120_v13, %v1112_v52 }
 0x287   :  { %v294_v15 = vpack.c.bf16 %v292_v14, %v292_v14 }
 0x289   :  { %v1122_v16 = vpop.eup %1121  ;;  %1021 = vmatmul.msk.bf16.vlgmr.msra.gmra.mxu2 %vm108_vm1, %v294_v15 }
 0x28a   :  { %v172_v17 = vmul.f32 %v1122_v16, %v1114_v54 }
 0x28c   :  { %v174_v20 = vpack.c.bf16 %v172_v17, %v172_v17 }
 0x28e   :  { %1017 = vmatmul.msk.bf16.vlgmr.msra.gmra.mxu3 %vm108_vm1, %v174_v20 }
 0x295   :  { %v318_v22 = vpop.permute.xlu0 %317  ;;  %v380_v24 = vpop.permute.xlu1 %379 }
 0x296   :  { %v323_v23 = vsel %vm181_vm2, %v318_v22, 0 }
 0x297   :  { %332 = vmatpush.bf16.msra.mxu3 %v323_v23 }
 0x299   :  { %1025 = vmatmul.msk.bf16.vlgmr.msrb.gmra.mxu2 %vm108_vm1, %v380_v24 }
 0x29a   :  { %v289_v25 = vpop.xlane.xlu2 %288 }
 0x29d   :  { %v403_v39 = vpop.permute.xlu0 %402 }
 0x2a2   :  { %v450_v26 = vpop.permute.xlu2 %449 }
 0x2a3   :  { %v455_v27 = vsel %vm181_vm2, %v450_v26, 0 }
 0x2a4   :  { %464 = vmatpush.bf16.msrb.mxu0 %v455_v27 }
 0x2aa   :  { %v517_v35 = vpop.permute.xlu2 %516 }
 0x2ab   :  { %v522_v38 = vsel %vm108_vm1, %v517_v35, 0 }
 0x2b2   :  { %v540_v52 = vpop.permute.xlu2 %539 }
 0x2b3   :  { %v545_v55 = vsel %vm108_vm1, %v540_v52, 0 }
 0x2c0   :  { %v169_v28 = vpop.xlane.xlu1 %168 }
 0x2c1   :  { %1123 = vrcp.f32 %v169_v28 }
 0x2c2   :  { %1125 = vrcp.f32 %v289_v25 }
 0x2c7   :  { %v1124_v29 = vpop.eup %1123 }
 0x2c8   :  { %v173_v30 = vmul.f32 %v1124_v29, %v1118_v6  ;;  %v1126_v32 = vpop.eup %1125 }
 0x2c9   :  { %v293_v33 = vmul.f32 %v1126_v32, %v1116_v0 }
 0x2ca   :  { %v175_v31 = vpack.c.bf16 %v173_v30, %v173_v30 }
 0x2cb   :  { %v295_v37 = vpack.c.bf16 %v293_v33, %v293_v33 }
 0x2cc   :  { %1018 = vmatmul.msk.bf16.vlgmr.msrb.gmra.mxu3 %vm108_vm1, %v175_v31 }
 0x2d8   :  { %v405_v34 = vpop.permute.xlu1 %404 }
 0x2d9   :  { %v410_v36 = vsel %vm108_vm1, %v405_v34, 0 }
 0x2da   :  { %419 = vmatpush.bf16.xpose.msrb.mxu3 %v410_v36 }
 0x2dc   :  { %1022 = vmatmul.msk.bf16.vlgmr.msra.gmra.mxu3 %vm108_vm1, %v295_v37 }
 0x2e2   :  { %531 = vmatpush.bf16.xpose.msra.mxu3 %v522_v38 }
 0x2ec   :  { %1026 = vmatmul.msk.bf16.vlgmr.msrb.gmra.mxu3 %vm108_vm1, %v403_v39 }
 0x30c   :  { %v313_v40 = vpop.f32.mrf.mxu2 }
 0x311   :  { %v194_v41 = vpop.f32.mrf.mxu3 }
 0x314   :  { %v315_v42 = vpop.f32.mrf.mxu2 }
 0x319   :  { %v196_v43 = vpop.f32.mrf.mxu3 }
 0x31c   :  { %v398_v44 = vpop.f32.mrf.mxu2 }
 0x31d   :  { %v425_v45 = vsel %vm108_vm1, %v398_v44, -inf }
 0x31e   :  { %426 = vmax.xlane.f32.xlu0 %v425_v45 }
 0x324   :  { %v400_v46 = vpop.f32.mrf.mxu2 }
 0x332   :  { %514 = vrot.lane.b32.xlu0 %v1290_v19, %s1196_s27 }
 0x34f   :  { %v215_v49 = vpop.f32.mrf.mxu3 }
 0x350   :  { %v219_v50 = vpack.c.bf16 %v215_v49, %v194_v41 }
 0x352   :  { %1024 = vmatmul.msk.bf16.vlgmr.msrb.gmra.mxu1 %vm108_vm1, %v219_v50 }
 0x357   :  { %v217_v51 = vpop.f32.mrf.mxu3 }
 0x35f   :  { %v334_v53 = vpop.f32.mrf.mxu3 }
 0x360   :  { %v338_v54 = vpack.c.bf16 %v334_v53, %v313_v40 }
 0x362   :  { %1023 = vmatmul.msk.bf16.vlgmr.msra.gmra.mxu0 %vm108_vm1, %v338_v54 }
 0x363   :  { %554 = vmatpush.bf16.xpose.msra.mxu0 %v545_v55 }
 0x367   :  { %v336_v56 = vpop.f32.mrf.mxu3 }
 0x36f   :  { %v421_v57 = vpop.f32.mrf.mxu3 }
 0x370   :  { %v428_v58 = vsel %vm108_vm1, %v421_v57, -inf }
 0x371   :  { %429 = vmax.xlane.f32.xlu2 %v428_v58 }
 0x377   :  { %v423_v59 = vpop.f32.mrf.mxu3 }
 0x391   :  { %v427_v19 = vpop.xlane.xlu0 %426 }
 0x392   :  { %v431_v60 = vsub.f32 %v398_v44, %v427_v19 }
 0x394   :  { %v433_v61 = vmul.f32 1.442695, %v431_v60 }
 0x396   :  { %1127 = vpow2.f32 %v433_v61 }
 0x39c   :  { %v1128_v62 = vpop.eup %1127 }
 0x39d   :  { %v437_v63 = vsel %vm108_vm1, %v1128_v62, 0.0 }
 0x39e   :  { %438 = vadd.xlane.f32.xlu1 %v437_v63 }
 0x3a4   :  { %v515_v0 = vpop.permute.xlu0 %514 }
 0x3a5   :  { %1030 = vmatmul.msk.bf16.vlgmr.msra.gmra.mxu3 %vm108_vm1, %v515_v0 }
 0x3b7   :  { %537 = vrot.lane.b32.xlu1 %v1295_v21, %s1196_s27 }
 0x3bf   :  { %470 = vrot.lane.b32.xlu1 %v1288_v18, %s1194_s21 }
 0x3cf   :  { %v374_v1 = vpop.f32.mrf.mxu1 }
 0x3d7   :  { %v376_v40 = vpop.f32.mrf.mxu1 }
 0x3df   :  { %v354_v2 = vpop.f32.mrf.mxu0 }
 0x3e0   :  { %v1365_v3 = vadd.f32 %v374_v1, %v354_v2 }
 0x3e4   :  { %v430_v4 = vpop.xlane.xlu2 %429 }
 0x3e5   :  { %v432_v5 = vsub.f32 %v421_v57, %v430_v4  ;;  %v1104_v4 = vld [vmem:[%s1501_s4] ss:$0 sm:$0xff] }
 0x3e7   :  { %v435_v6 = vmul.f32 1.442695, %v432_v5  ;;  %v356_v29 = vpop.f32.mrf.mxu0 }
 0x3e9   :  { %1129 = vpow2.f32 %v435_v6 }
 0x3ef   :  { %v1130_v7 = vpop.eup %1129 }
 0x3f0   :  { %v440_v8 = vsel %vm108_vm1, %v1130_v7, 0.0 }
 0x3f1   :  { %441 = vadd.xlane.f32.xlu0 %v440_v8 }
 0x405   :  { %605 = vrot.lane.b32.xlu0 %v1288_v18, %s1197_s28  ;;  %v101_v18 = vld [vmem:[%s1500_s3 + $0x8] sm:$0xf] }
 0x406   :  { %v496_v22 = vsel %vm181_vm2, %v101_v18, 0  ;;  %v1198_v18 = vmov 32.0  }
 0x407   :  { %505 = vmatpush.bf16.msra.mxu2 %v496_v22 }
 0x411   :  { %v439_v21 = vpop.xlane.xlu1 %438 }
 0x412   :  { %1131 = vrcp.f32 %v439_v21  ;;  %v377_v21 = vadd.f32 %v376_v40, %v356_v29 }
 0x418   :  { %v1132_v10 = vpop.eup %1131 }
 0x419   :  { %v445_v11 = vmul.f32 %v1132_v10, %v1128_v62 }
 0x41b   :  { %v447_v12 = vpack.c.bf16 %v445_v11, %v445_v11 }
 0x41d   :  { %1027 = vmatmul.msk.bf16.vlgmr.msrb.gmra.mxu0 %vm108_vm1, %v447_v12 }
 0x428   :  { %v533_v13 = vpop.f32.mrf.mxu3 }
 0x429   :  { %v538_v14 = vpop.permute.xlu1 %537  ;;  %v560_v15 = vsel %vm108_vm1, %v533_v13, -inf }
 0x42a   :  { %561 = vmax.xlane.f32.xlu2 %v560_v15 }
 0x42d   :  { %1031 = vmatmul.msk.bf16.vlgmr.msra.gmra.mxu0 %vm108_vm1, %v538_v14 }
 0x430   :  { %v535_v16 = vpop.f32.mrf.mxu3 }
 0x431   :  { %v471_v17 = vpop.permute.xlu1 %470 }
 0x432   :  { %v476_v20 = vsel %vm181_vm2, %v471_v17, 0 }
 0x433   :  { %485 = vmatpush.bf16.msra.mxu1 %v476_v20 }
 0x464   :  { %v442_v23 = vpop.xlane.xlu0 %441 }
 0x465   :  { %1133 = vrcp.f32 %v442_v23 }
 0x46b   :  { %v1134_v24 = vpop.eup %1133 }
 0x46c   :  { %v446_v25 = vmul.f32 %v1134_v24, %v1130_v7 }
 0x46e   :  { %v448_v26 = vpack.c.bf16 %v446_v25, %v446_v25 }
 0x470   :  { %1028 = vmatmul.msk.bf16.vlgmr.msra.gmra.mxu1 %vm108_vm1, %v448_v26 }
 0x477   :  { %v606_v27 = vpop.permute.xlu0 %605 }
 0x478   :  { %v611_v28 = vsel %vm181_vm2, %v606_v27, 0 }
 0x479   :  { %620 = vmatpush.bf16.msrb.mxu2 %v611_v28 }
 0x49a   :  { %v466_v30 = vpop.f32.mrf.mxu0 }
 0x49d   :  { %v562_v31 = vpop.xlane.xlu2 %561 }
 0x49e   :  { %v566_v32 = vsub.f32 %v533_v13, %v562_v31 }
 0x4a0   :  { %v568_v33 = vmul.f32 1.442695, %v566_v32 }
 0x4a2   :  { %1135 = vpow2.f32 %v568_v33  ;;  %v468_v34 = vpop.f32.mrf.mxu0 }
 0x4a8   :  { %v1136_v35 = vpop.eup %1135 }
 0x4a9   :  { %v572_v36 = vsel %vm108_vm1, %v1136_v35, 0.0 }
 0x4aa   :  { %v556_v37 = vpop.f32.mrf.mxu0  ;;  %573 = vadd.xlane.f32.xlu2 %v572_v36 }
 0x4ab   :  { %v563_v38 = vsel %vm108_vm1, %v556_v37, -inf }
 0x4ac   :  { %564 = vmax.xlane.f32.xlu1 %v563_v38  ;;  %v1080_v38 = vld [vmem:[%s1506_s9 + $0x8] sm:$0xff] }
 0x4ad   :  { %750 = vmatpush.bf16.msrb.mxu0 %v1080_v38 }
 0x4b2   :  { %v558_v39 = vpop.f32.mrf.mxu0 }
 0x4ed   :  { %v487_v41 = vpop.f32.mrf.mxu1 }
 0x4ee   :  { %v491_v42 = vpack.c.bf16 %v487_v41, %v466_v30 }
 0x4f0   :  { %1029 = vmatmul.msk.bf16.vlgmr.msra.gmra.mxu2 %vm108_vm1, %v491_v42  ;;  %v1079_v42 = vld [vmem:[%s1506_s9] sm:$0xff] }
 0x4f1   :  { %751 = vmatpush.bf16.msrb.mxu0 %v1079_v42 }
 0x4f5   :  { %v489_v43 = vpop.f32.mrf.mxu1 }
 0x51d   :  { %v574_v51 = vpop.xlane.xlu2 %573 }
 0x51f   :  { %v565_v44 = vpop.xlane.xlu1 %564 }
 0x520   :  { %v567_v45 = vsub.f32 %v556_v37, %v565_v44 }
 0x522   :  { %v570_v46 = vmul.f32 1.442695, %v567_v45 }
 0x524   :  { %1137 = vpow2.f32 %v570_v46 }
 0x525   :  { %1139 = vrcp.f32 %v574_v51 }
 0x52a   :  { %v1138_v47 = vpop.eup %1137 }
 0x52b   :  { %v575_v48 = vsel %vm108_vm1, %v1138_v47, 0.0  ;;  %v1140_v53 = vpop.eup %1139 }
 0x52c   :  { %576 = vadd.xlane.f32.xlu2 %v575_v48  ;;  %v580_v55 = vmul.f32 %v1140_v53, %v1136_v35 }
 0x52e   :  { %v582_v19 = vpack.c.bf16 %v580_v55, %v580_v55 }
 0x544   :  { %584 = vrot.lane.b32.xlu2 %v1284_v9, %s1197_s28  ;;  %v102_v9 = vld [vmem:[%s1500_s3 + $0xc] sm:$0xf] }
 0x545   :  { %v631_v60 = vsel %vm181_vm2, %v102_v9, 0 }
 0x546   :  { %640 = vmatpush.bf16.msrb.mxu3 %v631_v60  ;;  %v1106_v60 = vld [vmem:[%s1503_s6] ss:$0 sm:$0xff] }
 0x573   :  { %v507_v49 = vpop.f32.mrf.mxu2 }
 0x574   :  { %v512_v50 = vadd.f32 %v507_v49, %v1365_v3  ;;  %v46_v3 = vld [vmem:[%s1497_s0] sm:$0xff]  }
 0x575   :  { %v48_v7 = vunpack.c.l.bf16 %v46_v3  ;;  %v49_v15 = vunpack.c.h.bf16 %v46_v3  ;;  %v1107_v3 = vld [vmem:[%s1507_s10] ss:$0 sm:$0xff] }
 0x57b   :  { %v509_v61 = vpop.f32.mrf.mxu2 }
 0x57c   :  { %v513_v11 = vadd.f32 %v509_v61, %v377_v21 }
 0x59f   :  { %v577_v52 = vpop.xlane.xlu2 %576 }
 0x5a0   :  { %1141 = vrcp.f32 %v577_v52 }
 0x5a1   :  { %1143 = vrcp.f32 %v1198_v18 }
 0x5a6   :  { %v1142_v54 = vpop.eup %1141 }
 0x5a7   :  { %v581_v56 = vmul.f32 %v1142_v54, %v1138_v47  ;;  %v585_v57 = vpop.permute.xlu2 %584  ;;  %v1144_v22 = vpop.eup %1143 }
 0x5a8   :  { %v590_v58 = vsel %vm181_vm2, %v585_v57, 0  ;;  %v666_v23 = vmul.f32 32.0, %v1144_v22  ;;  %vm670_vm3 = vweird.f32 %v1144_v22 }
 0x5a9   :  { %v583_v59 = vpack.c.bf16 %v581_v56, %v581_v56  ;;  %599 = vmatpush.bf16.msrb.mxu1 %v590_v58  ;;  %v1105_v58 = vld [vmem:[%s1502_s5] ss:$0 sm:$0xff]  ;;  %s1200_s5 = smov 4  }
 0x5aa   :  { %v667_v24 = vsub.f32 1.0, %v666_v23 }
 0x5ab   :  { %1033 = vmatmul.msk.bf16.vlgmr.msrb.gmra.mxu2 %vm108_vm1, %v583_v59 }
 0x5ac   :  { %1032 = vmatmul.msk.bf16.vlgmr.msrb.gmra.mxu1 %vm108_vm1, %v582_v19  ;;  %v668_v25 = vmul.f32 %v1144_v22, %v667_v24 }
 0x5ae   :  { %v669_v26 = vadd.f32 %v1144_v22, %v668_v25  ;;  %v1084_v25 = vld [vmem:[%s1508_s11 + $0x18] sm:$0xff] }
 0x5b0   :  { %v1403_v27 = vsel %vm670_vm3, %v1144_v22, %v669_v26 }
 0x629   :  { %v601_v62 = vpop.f32.mrf.mxu1 }
 0x62e   :  { %v622_v63 = vpop.f32.mrf.mxu2 }
 0x62f   :  { %v626_v0 = vpack.c.bf16 %v622_v63, %v601_v62 }
 0x631   :  { %v603_v1 = vpop.f32.mrf.mxu1  ;;  %1034 = vmatmul.msk.bf16.vlgmr.msrb.gmra.mxu3 %vm108_vm1, %v626_v0 }
 0x636   :  { %v624_v2 = vpop.f32.mrf.mxu2 }
 0x6b4   :  { %v642_v5 = vpop.f32.mrf.mxu3 }
 0x6b5   :  { %v647_v6 = vadd.f32 %v642_v5, %v512_v50 }
 0x6b7   :  { %v653_v8 = vadd.f32 %v1104_v4, %v647_v6 }
 0x6b9   :  { %v655_v10 = vadd.f32 %v653_v8, %v48_v7  ;;  %v1088_v7 = vld [vmem:[%s1508_s11 + $0x38] sm:$0xff] }
 0x6ba   :  { %907 = vmatpush.bf16.msra.mxu1 %v1088_v7 }
 0x6bb   :  { %v659_v12 = vsel %vm75_vm0, %v655_v10, 0.0 }
 0x6bc   :  { %v644_v13 = vpop.f32.mrf.mxu3  ;;  %660 = vadd.xlane.f32.xlu1 %v659_v12 }
 0x6bd   :  { %v648_v14 = vadd.f32 %v644_v13, %v513_v11  ;;  %v1087_v11 = vld [vmem:[%s1508_s11 + $0x30] sm:$0xff] }
 0x6be   :  { %908 = vmatpush.bf16.msra.mxu1 %v1087_v11 }
 0x6bf   :  { %v654_v16 = vadd.f32 %v1104_v4, %v648_v14 }
 0x6c1   :  { %v656_v17 = vadd.f32 %v654_v16, %v49_v15  ;;  %v1086_v15 = vld [vmem:[%s1508_s11 + $0x28] sm:$0xff] }
 0x6c2   :  { %909 = vmatpush.bf16.msra.mxu1 %v1086_v15 }
 0x6c3   :  { %v662_v20 = vsel %vm75_vm0, %v656_v17, 0.0 }
 0x6c4   :  { %663 = vadd.xlane.f32.xlu0 %v662_v20  ;;  %v1085_v20 = vld [vmem:[%s1508_s11 + $0x20] sm:$0xff] }
 0x6c6   :  { %910 = vmatpush.bf16.msra.mxu1 %v1085_v20 }
 0x6ca   :  { %911 = vmatpush.bf16.msra.mxu1 %v1084_v25 }
 0x72f   :  { %v661_v28 = vpop.xlane.xlu1 %660 }
 0x730   :  { %v672_v29 = vmul.f32 %v1403_v27, %v661_v28 }
 0x732   :  { %v674_v30 = vsub.f32 %v655_v10, %v672_v29 }
 0x734   :  { %v676_v31 = vmul.f32 %v674_v30, %v674_v30 }
 0x736   :  { %v678_v32 = vsel %vm75_vm0, %v676_v31, 0.0  ;;  %v1083_v31 = vld [vmem:[%s1508_s11 + $0x10] sm:$0xff] }
 0x737   :  { %v664_v33 = vpop.xlane.xlu0 %663  ;;  %679 = vadd.xlane.f32.xlu1 %v678_v32  ;;  %912 = vmatpush.bf16.msra.mxu1 %v1083_v31 }
 0x738   :  { %v673_v34 = vmul.f32 %v1403_v27, %v664_v33 }
 0x73a   :  { %v675_v35 = vsub.f32 %v656_v17, %v673_v34 }
 0x73c   :  { %v677_v36 = vmul.f32 %v675_v35, %v675_v35 }
 0x73e   :  { %v681_v37 = vsel %vm75_vm0, %v677_v36, 0.0 }
 0x73f   :  { %682 = vadd.xlane.f32.xlu1 %v681_v37 }
 0x7aa   :  { %v680_v39 = vpop.xlane.xlu1 %679 }
 0x7ab   :  { %v684_v40 = vmul.f32 %v680_v39, %v1403_v27  ;;  %v1082_v39 = vld [vmem:[%s1508_s11 + $0x8] sm:$0xff] }
 0x7ac   :  { %913 = vmatpush.bf16.msra.mxu1 %v1082_v39 }
 0x7ad   :  { %v686_v41 = vadd.f32 1e-05, %v684_v40 }
 0x7af   :  { %1145 = vrsqrt.f32 %v686_v41  ;;  %vm694_vm5 = vweird.f32 %v686_v41 }
 0x7b2   :  { %v683_v43 = vpop.xlane.xlu1 %682 }
 0x7b3   :  { %v685_v44 = vmul.f32 %v683_v43, %v1403_v27 }
 0x7b5   :  { %v1146_v45 = vpop.eup %1145  ;;  %v687_v46 = vadd.f32 1e-05, %v685_v44 }
 0x7b6   :  { %v689_v47 = vmul.f32 %v1146_v45, %v686_v41  ;;  %vm695_vm4 = vweird.f32 %v1146_v45 }
 0x7b7   :  { %1147 = vrsqrt.f32 %v687_v46  ;;  %vm696_vm6 = vmor %vm694_vm5, %vm695_vm4  ;;  %vm704_vm8 = vweird.f32 %v687_v46 }
 0x7b8   :  { %v690_v48 = vmul.f32 %v1146_v45, %v689_v47  ;;  %v1081_v47 = vld [vmem:[%s1508_s11] sm:$0xff] }
 0x7b9   :  { %914 = vmatpush.bf16.msra.mxu1 %v1081_v47 }
 0x7ba   :  { %v691_v49 = vmul.f32 0.5, %v690_v48 }
 0x7bc   :  { %v692_v50 = vsub.f32 1.5, %v691_v49 }
 0x7bd   :  { %v1148_v51 = vpop.eup %1147 }
 0x7be   :  { %v693_v52 = vmul.f32 %v1146_v45, %v692_v50  ;;  %v699_v53 = vmul.f32 %v1148_v51, %v687_v46  ;;  %vm705_vm7 = vweird.f32 %v1148_v51 }
 0x7bf   :  { %vm706_vm9 = vmor %vm704_vm8, %vm705_vm7 }
 0x7c0   :  { %v700_v54 = vmul.f32 %v1148_v51, %v699_v53  ;;  %v697_v55 = vsel %vm696_vm6, %v1146_v45, %v693_v52 }
 0x7c1   :  { %v708_v59 = vmul.f32 %v697_v55, %v674_v30 }
 0x7c2   :  { %v701_v56 = vmul.f32 0.5, %v700_v54 }
 0x7c3   :  { %v713_v61 = vmul.f32 %v1105_v58, %v708_v59 }
 0x7c4   :  { %v702_v57 = vsub.f32 1.5, %v701_v56 }
 0x7c5   :  { %v1423_v0 = vadd.f32 %v1106_v60, %v713_v61 }
 0x7c6   :  { %v703_v19 = vmul.f32 %v1148_v51, %v702_v57 }
 0x7c8   :  { %v707_v9 = vsel %vm706_vm9, %v1148_v51, %v703_v19  ;;  %vm981_vm9 = vcmask 257024  }
 0x7c9   :  { %v709_v62 = vmul.f32 %v707_v9, %v675_v35 }
 0x7cb   :  { %v714_v63 = vmul.f32 %v1105_v58, %v709_v62 }
 0x7cd   :  { %v1425_v1 = vadd.f32 %v1106_v60, %v714_v63 }
 0x7cf   :  { %v720_v2 = vpack.c.bf16 %v1425_v1, %v1423_v0 }
 0x7d1   :  { %1043 = vmatmul.msk.bf16.vlgmr.msrb.gmra.mxu0 %vm75_vm0, %v720_v2 }
 0x84e   :  { %v753_v4 = vpop.f32.mrf.mxu0 }
 0x84f   :  { %v1433_v5 = vadd.f32 %v1107_v3, %v753_v4 }
 0x851   :  { %v1436_v6 = vmul.f32 0.70710677, %v1433_v5 }
 0x853   :  { %v762_v8 = vand.u32 2147483647, %v1436_v6  ;;  %vm828_vm3 = vcmp.ge.f32.partialorder %v1436_v6, 0.0  ;;  %v1108_v6 = vld [vmem:[%s1509_s12] ss:$0 sm:$0xff] }
 0x855   :  { %v764_v21 = vmul.f32 0.3275911, %v762_v8  ;;  %v816_v36 = vsub.f32 0.0, %v762_v8 }
 0x856   :  { %v755_v10 = vpop.f32.mrf.mxu0 }
 0x857   :  { %v766_v12 = vadd.f32 1.0, %v764_v21  ;;  %v1445_v13 = vadd.f32 %v1107_v3, %v755_v10  ;;  %v818_v43 = vmul.f32 %v816_v36, %v762_v8 }
 0x859   :  { %1149 = vrcp.f32 %v766_v12  ;;  %v1448_v14 = vmul.f32 0.70710677, %v1445_v13  ;;  %v779_v26 = vand.u32 2147483648, %v766_v12  ;;  %v777_v29 = vand.u32 2147483647, %v766_v12 }
 0x85a   :  { %vm773_vm11 = vweird.f32 %v766_v12  ;;  %v820_v51 = vmul.f32 1.442695, %v818_v43  ;;  %v759_v25 = vmul.f32 0.5, %v1445_v13 }
 0x85b   :  { %v763_v16 = vand.u32 2147483647, %v1448_v14  ;;  %v780_v32 = vor.u32 1.1754944e-38, %v779_v26  ;;  %vm778_vm13 = vcmp.eq.f32.partialorder %v777_v29, 8.507059e+37  ;;  %vm829_vm4 = vcmp.ge.f32.partialorder %v1448_v14, 0.0 }
 0x85d   :  { %v765_v17 = vmul.f32 0.3275911, %v763_v16  ;;  %v817_v55 = vsub.f32 0.0, %v763_v16 }
 0x85f   :  { %v1150_v18 = vpop.eup %1149  ;;  %v767_v23 = vadd.f32 1.0, %v765_v17  ;;  %v819_v19 = vmul.f32 %v817_v55, %v763_v16 }
 0x860   :  { %v769_v22 = vmul.f32 %v1150_v18, %v766_v12  ;;  %vm774_vm10 = vweird.f32 %v1150_v18 }
 0x861   :  { %1151 = vrcp.f32 %v767_v23  ;;  %vm775_vm12 = vmor %vm773_vm11, %vm774_vm10  ;;  %v794_v42 = vand.u32 2147483648, %v767_v23  ;;  %v792_v45 = vand.u32 2147483647, %v767_v23  ;;  %vm788_vm15 = vweird.f32 %v767_v23 }
 0x862   :  { %v770_v24 = vsub.f32 1.0, %v769_v22  ;;  %1153 = vpow2.f32 %v820_v51  ;;  %v822_v63 = vmul.f32 1.442695, %v819_v19 }
 0x863   :  { %v795_v50 = vor.u32 1.1754944e-38, %v794_v42  ;;  %vm793_vm2 = vcmp.eq.f32.partialorder %v792_v45, 8.507059e+37 }
 0x864   :  { %v771_v28 = vmul.f32 %v1150_v18, %v770_v24  ;;  %1155 = vpow2.f32 %v822_v63  ;;  %v758_v24 = vmul.f32 0.5, %v1433_v5 }
 0x866   :  { %v772_v30 = vadd.f32 %v1150_v18, %v771_v28 }
 0x867   :  { %v1152_v33 = vpop.eup %1151 }
 0x868   :  { %v776_v34 = vsel %vm775_vm12, %v1150_v18, %v772_v30  ;;  %v784_v37 = vmul.f32 %v1152_v33, %v767_v23  ;;  %vm789_vm14 = vweird.f32 %v1152_v33  ;;  %v1154_v2 = vpop.eup %1153 }
 0x869   :  { %v781_v35 = vsel %vm778_vm13, %v780_v32, %v776_v34  ;;  %vm790_vm1 = vmor %vm788_vm15, %vm789_vm14 }
 0x86a   :  { %v798_v38 = vmul.f32 1.0614054, %v781_v35  ;;  %v785_v40 = vsub.f32 1.0, %v784_v37  ;;  %v1156_v15 = vpop.eup %1155 }
 0x86c   :  { %v800_v41 = vadd.f32 -1.4531521, %v798_v38  ;;  %v786_v44 = vmul.f32 %v1152_v33, %v785_v40 }
 0x86e   :  { %v802_v46 = vmul.f32 %v800_v41, %v781_v35  ;;  %v787_v48 = vadd.f32 %v1152_v33, %v786_v44 }
 0x870   :  { %v804_v49 = vadd.f32 1.4214138, %v802_v46  ;;  %v791_v52 = vsel %vm790_vm1, %v1152_v33, %v787_v48 }
 0x871   :  { %v796_v54 = vsel %vm793_vm2, %v795_v50, %v791_v52 }
 0x872   :  { %v806_v53 = vmul.f32 %v804_v49, %v781_v35  ;;  %v799_v56 = vmul.f32 1.0614054, %v796_v54 }
 0x874   :  { %v808_v57 = vadd.f32 -0.28449672, %v806_v53  ;;  %v801_v58 = vadd.f32 -1.4531521, %v799_v56 }
 0x876   :  { %v810_v59 = vmul.f32 %v808_v57, %v781_v35  ;;  %v803_v9 = vmul.f32 %v801_v58, %v796_v54  ;;  %v1109_v58 = vld [vmem:[%s1504_s7] ss:$0 sm:$0xff]  ;;  %s1199_s7 = smov [#allocation2]  }
 0x877   :  { %s988_s20 = sshll.u32 %s1199_s7, 4  ;;  %s989_s20 = int_to_ptr.vmem [resolvable:$true] %s988_s20 }
 0x878   :  { %v812_v60 = vadd.f32 0.2548296, %v810_v59  ;;  %v805_v61 = vadd.f32 1.4214138, %v803_v9 }
 0x87a   :  { %v814_v62 = vmul.f32 %v812_v60, %v781_v35  ;;  %v807_v3 = vmul.f32 %v805_v61, %v796_v54 }
 0x87c   :  { %v824_v4 = vmul.f32 %v1154_v2, %v814_v62  ;;  %v809_v7 = vadd.f32 -0.28449672, %v807_v3 }
 0x87e   :  { %v826_v8 = vsub.f32 1.0, %v824_v4  ;;  %v811_v21 = vmul.f32 %v809_v7, %v796_v54 }
 0x880   :  { %v813_v10 = vadd.f32 0.2548296, %v811_v21  ;;  %v830_v11 = vsub.f32 0.0, %v826_v8 }
 0x882   :  { %v815_v12 = vmul.f32 %v813_v10, %v796_v54  ;;  %v832_v16 = vsel %vm828_vm3, %v826_v8, %v830_v11 }
 0x883   :  { %v834_v22 = vadd.f32 1.0, %v832_v16 }
 0x884   :  { %v825_v17 = vmul.f32 %v1156_v15, %v815_v12 }
 0x885   :  { %v836_v28 = vmul.f32 %v834_v22, %v758_v24 }
 0x886   :  { %v827_v20 = vsub.f32 1.0, %v825_v17 }
 0x888   :  { %v831_v18 = vsub.f32 0.0, %v827_v20 }
 0x88a   :  { %v833_v23 = vsel %vm829_vm4, %v827_v20, %v831_v18 }
 0x88b   :  { %v835_v26 = vadd.f32 1.0, %v833_v23 }
 0x88d   :  { %v837_v29 = vmul.f32 %v835_v26, %v759_v25 }
 0x88f   :  { %v838_v30 = vpack.c.bf16 %v837_v29, %v836_v28 }
 0x891   :  { %915 = vmatmul.bf16.vlgmr.msra.gmra.mxu1 %v838_v30 }
 0x90e   :  { %v916_v31 = vpop.f32.mrf.mxu1 }
 0x90f   :  { %v917_v32 = vadd.f32 %v1108_v6, %v916_v31 }
 0x911   :  { %v921_v33 = vadd.f32 %v917_v32, %v1423_v0 }
 0x913   :  { %v925_v14 = vsel %vm75_vm0, %v921_v33, 0.0 }
 0x914   :  { %926 = vadd.xlane.f32.xlu2 %v925_v14 }
 0x916   :  { %v918_v34 = vpop.f32.mrf.mxu1 }
 0x917   :  { %v919_v5 = vadd.f32 %v1108_v6, %v918_v34 }
 0x919   :  { %v922_v13 = vadd.f32 %v919_v5, %v1425_v1 }
 0x91b   :  { %v928_v35 = vsel %vm75_vm0, %v922_v13, 0.0 }
 0x91c   :  { %929 = vadd.xlane.f32.xlu1 %v928_v35 }
 0x987   :  { %v927_v36 = vpop.xlane.xlu2 %926 }
 0x988   :  { %v931_v37 = vmul.f32 %v927_v36, %v1403_v27 }
 0x98a   :  { %v933_v38 = vsub.f32 %v921_v33, %v931_v37 }
 0x98c   :  { %v935_v39 = vmul.f32 %v933_v38, %v933_v38 }
 0x98e   :  { %v937_v40 = vsel %vm75_vm0, %v935_v39, 0.0 }
 0x98f   :  { %v930_v41 = vpop.xlane.xlu1 %929  ;;  %938 = vadd.xlane.f32.xlu1 %v937_v40 }
 0x990   :  { %v932_v0 = vmul.f32 %v930_v41, %v1403_v27 }
 0x992   :  { %v934_v42 = vsub.f32 %v922_v13, %v932_v0 }
 0x994   :  { %v936_v43 = vmul.f32 %v934_v42, %v934_v42 }
 0x996   :  { %v940_v44 = vsel %vm75_vm0, %v936_v43, 0.0 }
 0x997   :  { %941 = vadd.xlane.f32.xlu1 %v940_v44 }
 0xa02   :  { %v939_v1 = vpop.xlane.xlu1 %938 }
 0xa03   :  { %v943_v45 = vmul.f32 %v939_v1, %v1403_v27 }
 0xa05   :  { %v945_v46 = vadd.f32 1e-05, %v943_v45 }
 0xa07   :  { %1157 = vrsqrt.f32 %v945_v46  ;;  %vm953_vm0 = vweird.f32 %v945_v46 }
 0xa0a   :  { %v942_v47 = vpop.xlane.xlu1 %941 }
 0xa0b   :  { %v944_v48 = vmul.f32 %v942_v47, %v1403_v27  ;;  %v1110_v27 = vld [vmem:[%s1505_s8] ss:$0 sm:$0xff]  ;;  %s990_s8 = sshll.u32 %s1510_s13, 4  ;;  %s991_s8 = int_to_ptr.hbm [resolvable:$true] %s990_s8 }
 0xa0d   :  { %v1158_v49 = vpop.eup %1157  ;;  %v946_v50 = vadd.f32 1e-05, %v944_v48 }
 0xa0e   :  { %v948_v51 = vmul.f32 %v1158_v49, %v945_v46  ;;  %vm954_vm5 = vweird.f32 %v1158_v49 }
 0xa0f   :  { %1159 = vrsqrt.f32 %v946_v50  ;;  %vm955_vm6 = vmor %vm953_vm0, %vm954_vm5  ;;  %vm963_vm8 = vweird.f32 %v946_v50 }
 0xa10   :  { %v949_v52 = vmul.f32 %v1158_v49, %v948_v51 }
 0xa12   :  { %v950_v53 = vmul.f32 0.5, %v949_v52 }
 0xa14   :  { %v951_v54 = vsub.f32 1.5, %v950_v53 }
 0xa15   :  { %v1160_v55 = vpop.eup %1159 }
 0xa16   :  { %v952_v56 = vmul.f32 %v1158_v49, %v951_v54  ;;  %v958_v57 = vmul.f32 %v1160_v55, %v946_v50  ;;  %vm964_vm7 = vweird.f32 %v1160_v55 }
 0xa17   :  { %vm965_vm10 = vmor %vm963_vm8, %vm964_vm7 }
 0xa18   :  { %v956_v59 = vsel %vm955_vm6, %v1158_v49, %v952_v56  ;;  %v959_v19 = vmul.f32 %v1160_v55, %v958_v57 }
 0xa19   :  { %v967_v9 = vmul.f32 %v956_v59, %v933_v38 }
 0xa1a   :  { %v960_v60 = vmul.f32 0.5, %v959_v19 }
 0xa1b   :  { %v972_v61 = vmul.f32 %v1109_v58, %v967_v9 }
 0xa1c   :  { %v961_v62 = vsub.f32 1.5, %v960_v60 }
 0xa1d   :  { %v977_v63 = vadd.f32 %v1110_v27, %v972_v61 }
 0xa1e   :  { %v962_v2 = vmul.f32 %v1160_v55, %v961_v62 }
 0xa1f   :  { %v979_v3 = vpack.c.bf16 %v977_v63, %v977_v63 }
 0xa20   :  { %v966_v4 = vsel %vm965_vm10, %v1160_v55, %v962_v2 }
 0xa21   :  { %v968_v7 = vmul.f32 %v966_v4, %v934_v42  ;;  %982 = vst.msk [vmem:[#allocation2] sm:$0xf] %vm981_vm9, %v979_v3 }
 0xa23   :  { %v973_v8 = vmul.f32 %v1109_v58, %v968_v7 }
 0xa25   :  { %v978_v21 = vadd.f32 %v1110_v27, %v973_v8 }
 0xa27   :  { %v980_v10 = vpack.c.bf16 %v978_v21, %v978_v21 }
 0xa29   :  { %983 = vst.msk [vmem:[#allocation2 + $0x4] sm:$0xf] %vm981_vm9, %v980_v10 }
 0xa2a   :  { %996 = dma.vmem_to_hbm [thread:$0]  %s989_s20, 128, %s991_s8, [#allocation3], %s1192_s19, %s1192_s19, %s1200_s5  }
 0xa2b   :  { %1185 = dma.done.wait [#allocation3], 128  }
 0xa2c   :  { %1186 = vsyncadd [#allocation3], 4294967168 }
 0xa2d   :  { %1001 = vsyncpa [#allocation3], 1 }

</bundles_post_ra>
